<compile_context>
chip_gen: v5e
topology: v5e:2x2
jax: 0.10.0
libtpu: 0.0.40
codegen_flags: <defaults>
</compile_context>

<pallas_src>
import numpy as np
import jax
import jax.numpy as jnp
from jax import lax
from jax.experimental import pallas as pl
from jax.experimental.pallas import tpu as pltpu


# ----------------------------- fused Pallas kernel ----------------------------

def dcmsa_kernel(x0_ref, x1_ref, x2_ref, x3_ref,
                 lin_w_ref, lin_b_ref, ln1g_ref, ln1b_ref, ln2g_ref, ln2b_ref,
                 fcwt_ref, fcb_ref,
                 ps_l_ref, ps_r_ref, d0a_ref, d0b_ref, cv2r_ref, shl_ref,
                 d2r_ref, d2l_ref, d3r_ref, d3l_ref,
                 g_ref, gt_ref, msel_ref,
                 scal_ref,
                 y0_ref, y1_ref, dcca_ref, dcsa_ref):
    f32 = jnp.float32
    bf16 = jnp.bfloat16

    x0 = x0_ref[0]                              # (C,  HW)  lane-dense f32
    x1 = x1_ref[0]                              # (C1, HW)
    C, HW = x0.shape
    C1 = x1.shape[0]
    H = msel_ref.shape[0]
    W = HW // H

    def mm(a, b):
        # bf16 MXU matmul, f32 accumulation (no HIGHEST multi-pass emulation).
        return jnp.dot(a.astype(bf16), b.astype(bf16),
                       preferred_element_type=f32)

    # -------- channel attention: PDCCA (Linear->LN->ReLU) + DCCAtt ----------
    # Linear(c1->c2): broadcast-multiply + lane reduce -> column (C2, 1)
    z = jnp.sum(lin_w_ref[...] * x2_ref[0], axis=1, keepdims=True) + lin_b_ref[...]
    mu = jnp.mean(z, axis=0, keepdims=True)
    var = jnp.mean(jnp.square(z - mu), axis=0, keepdims=True)
    pdcca = jnp.maximum(
        (z - mu) * lax.rsqrt(var + 1e-5) * ln1g_ref[...] + ln1b_ref[...], 0.0)

    # global average pool of x0 (lane reduce over HW) -> (C, 1)
    gap = jnp.sum(x0, axis=1, keepdims=True) * (1.0 / HW)

    # 1x1 conv (2->1) over [gap, pdcca] -> LayerNorm -> ReLU
    a = gap * scal_ref[0] + pdcca * scal_ref[1] + scal_ref[2]
    mu2 = jnp.mean(a, axis=0, keepdims=True)
    var2 = jnp.mean(jnp.square(a - mu2), axis=0, keepdims=True)
    a = jnp.maximum(
        (a - mu2) * lax.rsqrt(var2 + 1e-5) * ln2g_ref[...] + ln2b_ref[...], 0.0)

    # fc (1x1 conv C->C): sublane reduce against transposed weight -> row (1, C)
    logits = jnp.sum(fcwt_ref[...] * a, axis=0, keepdims=True) + fcb_ref[...]
    ca_row = jax.nn.sigmoid(logits)                                # (1, C)
    # TODO(synk): masked-reduce row->column flip; fine at C=8, switch to a
    # transpose (or keep row orientation end-to-end) for large C.
    eye_c = (lax.broadcasted_iota(jnp.int32, (C, C), 0)
             == lax.broadcasted_iota(jnp.int32, (C, C), 1)).astype(f32)
    ca = jnp.sum(eye_c * ca_row, axis=1, keepdims=True)            # (C, 1)

    rgb_ca = x0 * ca                                               # (C, HW)
    dcca_ref[0] = gap * ca                                         # (C, 1)

    # -------- PDCSA: 3x3 stride-2 conv as 3 small matmul pairs + BN + SiLU ---
    x3m = x3_ref[0]                                                # (Hin, Win) f32
    pd = jnp.zeros((H, W), f32)
    for dy in range(3):
        t = mm(ps_l_ref[dy], x3m)                                  # (H, Win)
        pd = pd + mm(t, ps_r_ref[dy])                              # (H, W)
    pd = pd * scal_ref[3] + scal_ref[4]
    pdcsa = pd * jax.nn.sigmoid(pd)                                # (H, W)

    # -------- DCSAtt_RCA ------------------------------------------------------
    # channel mean / max over concat([x0*CA, x1]) (sublane reduces, lane-dense)
    mean_row = (jnp.sum(rgb_ca, axis=0, keepdims=True)
                + jnp.sum(x1, axis=0, keepdims=True)) * (1.0 / (C + C1))
    max_row = jnp.maximum(jnp.max(rgb_ca, axis=0, keepdims=True),
                          jnp.max(x1, axis=0, keepdims=True))      # (1, HW)

    msel = msel_ref[...]                                           # (H, HW) 0/1 f32

    def hv_pool(row):
        # pool_h (per-row mean -> (H,1) column) + pool_w (per-col mean -> (1,W))
        rmean = jnp.sum(row * msel, axis=1, keepdims=True) * (1.0 / W)   # (H, 1)
        cmean = mm(row, g_ref[...]) * (1.0 / H)                          # (1, W)
        return rmean + cmean                                             # (H, W)

    p_mean = hv_pool(mean_row)
    p_max = hv_pool(max_row)

    # dconv0: (1,3) conv (2ch -> 1) + BN + ReLU + (3,1) conv
    t = mm(p_mean, d0a_ref[0]) + mm(p_max, d0a_ref[1]) + scal_ref[5]
    t = jnp.maximum(t * scal_ref[6] + scal_ref[7], 0.0)
    d0 = mm(d0b_ref[...], t) + scal_ref[8]                         # (H, W)

    # cv2: 3x3 conv over [d0, pdcsa] (band matmuls + row-shift matmuls)
    satt = jnp.zeros((H, W), f32)
    for dy in range(3):
        zr = mm(d0, cv2r_ref[dy]) + mm(pdcsa, cv2r_ref[3 + dy])
        satt = satt + mm(shl_ref[dy], zr)

    # dconv1 (k=1): pointwise
    t = satt * scal_ref[9] + scal_ref[10]
    t = jnp.maximum(t * scal_ref[11] + scal_ref[12], 0.0)
    dc1 = t * scal_ref[13] + scal_ref[14]

    # dconv2 (k=5)
    t = mm(satt, d2r_ref[...]) + scal_ref[15]
    t = jnp.maximum(t * scal_ref[16] + scal_ref[17], 0.0)
    dc2 = mm(d2l_ref[...], t) + scal_ref[18]

    # dconv3 (k=9)
    t = mm(satt, d3r_ref[...]) + scal_ref[19]
    t = jnp.maximum(t * scal_ref[20] + scal_ref[21], 0.0)
    dc3 = mm(d3l_ref[...], t) + scal_ref[22]

    # fusion 1x1 (3 -> 1) + sigmoid
    sa2 = jax.nn.sigmoid(dc1 * scal_ref[23] + dc2 * scal_ref[24] + dc3 * scal_ref[25])

    # -------- outputs ---------------------------------------------------------
    dcsa_ref[0] = d0 * sa2                                         # (H, W)

    # sa back to a lane-dense (1, HW) row for the C-channel residual updates
    sa_row = jnp.sum(mm(sa2, gt_ref[...]) * msel, axis=0, keepdims=True)   # (1, HW)
    y0_ref[0] = x0 + rgb_ca * sa_row
    y1_ref[0] = x1 + x1 * sa_row


# ------------------------ conv-as-small-matmul constant builders --------------

def _band_right(w, n):
    # (X @ R)[i, j] = sum_dx w[dx] * X[i, j + dx - k//2]   ('same' conv along cols)
    w = np.asarray(w, np.float32)
    k = w.shape[0]
    pad = k // 2
    m = np.arange(n)[:, None]
    j = np.arange(n)[None, :]
    idx = m - j + pad
    out = np.where((idx >= 0) & (idx < k), w[np.clip(idx, 0, k - 1)], 0.0)
    return out.astype(np.float32)


def _band_left(w, n):
    # (L @ X)[i, j] = sum_dy w[dy] * X[i + dy - k//2, j]
    return _band_right(w, n).T.copy()


def _bn_fold(bn, eps=1e-5):
    g = np.asarray(bn['g'], np.float32)
    b = np.asarray(bn['b'], np.float32)
    m = np.asarray(bn['m'], np.float32)
    v = np.asarray(bn['v'], np.float32)
    s = g / np.sqrt(v + eps)
    return s, b - m * s


def build_constants(P, H, W, Hin, Win):
    """Precompute weight-derived constants once per (weights, H, W) -- ~50 KB."""
    f32 = np.float32
    bf16 = jnp.bfloat16
    HW = H * W
    C2 = int(np.asarray(P['lin_w']).shape[0])

    # PDCSA 3x3 stride-2, pad 1, built over the UNPADDED (Hin, Win) x3 map:
    #   out = sum_dy S_dy @ X @ C_dy
    pw = np.asarray(P['pdcsa_w'], f32)[0, 0]                 # (3, 3)
    ps_l = np.zeros((3, H, Hin), f32)
    ps_r = np.zeros((3, Win, W), f32)
    for dy in range(3):
        for i in range(H):
            m = 2 * i + dy - 1
            if 0 <= m < Hin:
                ps_l[dy, i, m] = 1.0
        for j in range(W):
            for dx in range(3):
                m = 2 * j + dx - 1
                if 0 <= m < Win:
                    ps_r[dy, m, j] = pw[dy, dx]

    # dconv0: (1,3) conv right-matrices (2 in-channels) and (3,1) left-matrix
    d0w1 = np.asarray(P['d0']['w1'], f32)
    m_d0a = np.stack([_band_right(d0w1[0, c, 0], W) for c in range(2)])
    m_d0b = _band_left(np.asarray(P['d0']['w2'], f32)[0, 0, :, 0], H)

    # cv2 3x3: per (channel, dy) right band matrices + row-shift left matrices
    cvw = np.asarray(P['cv2_w'], f32)
    m_cv2r = np.stack([_band_right(cvw[0, c, dy], W)
                       for c in range(2) for dy in range(3)])      # (6, W, W)
    m_shl = np.zeros((3, H, H), f32)
    for dy in range(3):
        for i in range(H):
            m = i + dy - 1
            if 0 <= m < H:
                m_shl[dy, i, m] = 1.0

    # dconv2 (k=5) / dconv3 (k=9)
    m_d2r = _band_right(np.asarray(P['d2']['w1'], f32)[0, 0, 0], W)
    m_d2l = _band_left(np.asarray(P['d2']['w2'], f32)[0, 0, :, 0], H)
    m_d3r = _band_right(np.asarray(P['d3']['w1'], f32)[0, 0, 0], W)
    m_d3l = _band_left(np.asarray(P['d3']['w2'], f32)[0, 0, :, 0], H)

    # (1,HW) row <-> (H,W) tile helpers (0/1 selection matrices)
    marange = np.arange(HW)
    g_mat = (marange[:, None] % W == np.arange(W)[None, :]).astype(f32)   # (HW, W)
    gt_mat = g_mat.T.copy()                                               # (W, HW)
    msel = (marange[None, :] // W == np.arange(H)[:, None]).astype(f32)   # (H, HW)

    def sc(x):
        return float(np.asarray(x, f32).reshape(-1)[0])

    sps, spb = _bn_fold(P['pdcsa_bn'])
    bn0s, bn0b = _bn_fold(P['d0']['bn'])
    bn1s, bn1b = _bn_fold(P['d1']['bn'])
    bn2s, bn2b = _bn_fold(P['d2']['bn'])
    bn3s, bn3b = _bn_fold(P['d3']['bn'])
    scal = np.array([
        sc(P['ca_cw'][0]), sc(P['ca_cw'][1]), sc(P['ca_cb'][0]),        # 0..2
        sc(sps), sc(spb),                                               # 3..4
        sc(P['d0']['b1']), sc(bn0s), sc(bn0b), sc(P['d0']['b2']),       # 5..8
        sc(P['d1']['w1']), sc(P['d1']['b1']), sc(bn1s), sc(bn1b),       # 9..12
        sc(P['d1']['w2']), sc(P['d1']['b2']),                           # 13..14
        sc(P['d2']['b1']), sc(bn2s), sc(bn2b), sc(P['d2']['b2']),       # 15..18
        sc(P['d3']['b1']), sc(bn3s), sc(bn3b), sc(P['d3']['b2']),       # 19..22
        sc(P['fusion_w'][0, 0, 0, 0]), sc(P['fusion_w'][0, 1, 0, 0]),   # 23..24
        sc(P['fusion_w'][0, 2, 0, 0]),                                  # 25
    ], dtype=f32)

    return dict(
        # channel-attention params (VPU path -> keep f32)
        lin_w=jnp.asarray(P['lin_w'], jnp.float32),
        lin_b=jnp.asarray(P['lin_b'], jnp.float32).reshape(C2, 1),
        ln1_g=jnp.asarray(P['ln1_g'], jnp.float32).reshape(C2, 1),
        ln1_b=jnp.asarray(P['ln1_b'], jnp.float32).reshape(C2, 1),
        ln2_g=jnp.asarray(P['ln2_g'], jnp.float32).reshape(C2, 1),
        ln2_b=jnp.asarray(P['ln2_b'], jnp.float32).reshape(C2, 1),
        fc_wt=jnp.asarray(P['fc_w'], jnp.float32).T,
        fc_b=jnp.asarray(P['fc_b'], jnp.float32).reshape(1, C2),
        # separable conv matrices (MXU path -> bf16 at the dot boundary)
        ps_l=jnp.asarray(ps_l, bf16), ps_r=jnp.asarray(ps_r, bf16),
        d0a=jnp.asarray(m_d0a, bf16), d0b=jnp.asarray(m_d0b, bf16),
        cv2r=jnp.asarray(m_cv2r, bf16), shl=jnp.asarray(m_shl, bf16),
        d2r=jnp.asarray(m_d2r, bf16), d2l=jnp.asarray(m_d2l, bf16),
        d3r=jnp.asarray(m_d3r, bf16), d3l=jnp.asarray(m_d3l, bf16),
        g=jnp.asarray(g_mat, bf16), gt=jnp.asarray(gt_mat, bf16),
        msel=jnp.asarray(msel, jnp.float32),
        scal=jnp.asarray(scal),
    )


# ------------------------------- DCMSA wrapper --------------------------------

def dcmsa_pallas(x0, x1, x2, x3, consts):
    f32 = jnp.float32
    B, C, H, W = x0.shape
    C1 = x1.shape[1]
    C1in = x2.shape[1]
    HW = H * W

    # lane-dense views of the channel tensors; x3 stays an unpadded 2-D map
    x0f = x0.reshape(B, C, HW).astype(f32)
    x1f = x1.reshape(B, C1, HW).astype(f32)
    x2r = x2.reshape(B, 1, C1in).astype(f32)
    x3m = x3[:, 0].astype(f32)                      # (B, Hin, Win)

    def per_batch(shape):
        nd = len(shape)
        return pl.BlockSpec((1,) + tuple(shape[1:]),
                            lambda b, _n=nd: (b,) + (0,) * (_n - 1))

    def invariant(shape):
        nd = len(shape)
        return pl.BlockSpec(tuple(shape), lambda b, _n=nd: (0,) * _n)

    in_arrays = [
        x0f, x1f, x2r, x3m,
        consts['lin_w'], consts['lin_b'], consts['ln1_g'], consts['ln1_b'],
        consts['ln2_g'], consts['ln2_b'], consts['fc_wt'], consts['fc_b'],
        consts['ps_l'], consts['ps_r'], consts['d0a'], consts['d0b'],
        consts['cv2r'], consts['shl'], consts['d2r'], consts['d2l'],
        consts['d3r'], consts['d3l'],
        consts['g'], consts['gt'], consts['msel'],
        consts['scal'],
    ]
    in_specs = ([per_batch(a.shape) for a in in_arrays[:4]]
                + [invariant(a.shape) for a in in_arrays[4:-1]]
                + [pl.BlockSpec(memory_space=pltpu.MemorySpace.SMEM)])

    out_shapes = [
        jax.ShapeDtypeStruct((B, C, HW), f32),      # y0
        jax.ShapeDtypeStruct((B, C1, HW), f32),     # y1
        jax.ShapeDtypeStruct((B, C, 1), f32),       # DCCA
        jax.ShapeDtypeStruct((B, H, W), f32),       # DCSA
    ]
    out_specs = [per_batch((B, C, HW)), per_batch((B, C1, HW)),
                 per_batch((B, C, 1)), per_batch((B, H, W))]

    y0, y1, dcca, dcsa = pl.pallas_call(
        dcmsa_kernel,
        grid=(B,),
        in_specs=in_specs,
        out_specs=out_specs,
        out_shape=out_shapes,
        compiler_params=pltpu.CompilerParams(
            dimension_semantics=("parallel",)),     # constants are KB-scale now,
    )(*in_arrays)                                   # so megacore batch split is clean

    return (y0.reshape(B, C, H, W), y1.reshape(B, C1, H, W),
            dcca.reshape(B, C), dcsa.reshape(B, 1, H, W))


# ------------------------- pure-JAX reference (for check) ---------------------

def conv2d_ref(x, w, b=None, stride=1, pad=(0, 0)):
    out = jax.lax.conv_general_dilated(
        x, w, window_strides=(stride, stride),
        padding=((pad[0], pad[0]), (pad[1], pad[1])),
        dimension_numbers=('NCHW', 'OIHW', 'NCHW'))
    if b is not None:
        out = out + b.reshape(1, -1, 1, 1)
    return out


def bn_ref(x, bn, eps=1e-5):
    g, b, m, v = (bn['g'].reshape(1, -1, 1, 1), bn['b'].reshape(1, -1, 1, 1),
                  bn['m'].reshape(1, -1, 1, 1), bn['v'].reshape(1, -1, 1, 1))
    return (x - m) / jnp.sqrt(v + eps) * g + b


def ln_ref(x, g, b, eps=1e-5):
    mu = jnp.mean(x, axis=-1, keepdims=True)
    var = jnp.mean(jnp.square(x - mu), axis=-1, keepdims=True)
    return (x - mu) / jnp.sqrt(var + eps) * g + b


def dconv_ref(x, p, k):
    t = conv2d_ref(x, p['w1'], p['b1'], 1, (0, k // 2))
    t = jnp.maximum(bn_ref(t, p['bn']), 0.0)
    return conv2d_ref(t, p['w2'], p['b2'], 1, (k // 2, 0))


def dcmsa_ref(x0, x1, x2, x3, P):
    z = x2 @ P['lin_w'].T + P['lin_b']
    pdcca = jnp.maximum(ln_ref(z, P['ln1_g'], P['ln1_b']), 0.0)

    y = conv2d_ref(x3, P['pdcsa_w'], None, 2, (1, 1))
    y = bn_ref(y, P['pdcsa_bn'])
    pdcsa = y * jax.nn.sigmoid(y)

    gap = jnp.mean(x0, axis=(2, 3))
    a = P['ca_cw'][0] * gap + P['ca_cw'][1] * pdcca + P['ca_cb'][0]
    a = jnp.maximum(ln_ref(a, P['ln2_g'], P['ln2_b']), 0.0)
    CA = jax.nn.sigmoid(a @ P['fc_w'].T + P['fc_b'])
    DCCA = gap * CA

    rgb_ca = x0 * CA[:, :, None, None]
    xsa = jnp.concatenate([rgb_ca, x1], axis=1)
    mp = jnp.concatenate([jnp.mean(xsa, 1, keepdims=True),
                          jnp.max(xsa, 1, keepdims=True)], axis=1)
    out = jnp.mean(mp, axis=3, keepdims=True) + jnp.mean(mp, axis=2, keepdims=True)
    d0 = dconv_ref(out, P['d0'], 3)
    satt = conv2d_ref(jnp.concatenate([d0, pdcsa], 1), P['cv2_w'], None, 1, (1, 1))
    dc1 = dconv_ref(satt, P['d1'], 1)
    dc2 = dconv_ref(satt, P['d2'], 5)
    dc3 = dconv_ref(satt, P['d3'], 9)
    SA = jax.nn.sigmoid(conv2d_ref(jnp.concatenate([dc1, dc2, dc3], 1),
                                   P['fusion_w'], None, 1, (0, 0)))
    DCSA = d0 * SA
    return x0 + rgb_ca * SA, x1 + x1 * SA, DCCA, DCSA


# ----------------------------- deterministic params ---------------------------

def init_params(c1, c2, key):
    def take(shape, scale=0.3):
        nonlocal key
        key, sub = jax.random.split(key)
        return (scale * jax.random.normal(sub, shape)).astype(jnp.float32)

    def bn(c):
        return dict(g=1.0 + take((c,), 0.1), b=take((c,), 0.1),
                    m=take((c,), 0.1), v=1.0 + jnp.abs(take((c,), 0.2)))

    P = {}
    P['lin_w'] = take((c2, c1)); P['lin_b'] = take((c2,))
    P['ln1_g'] = 1.0 + take((c2,), 0.1); P['ln1_b'] = take((c2,), 0.1)
    P['ca_cw'] = take((2,)); P['ca_cb'] = take((1,))
    P['ln2_g'] = 1.0 + take((c2,), 0.1); P['ln2_b'] = take((c2,), 0.1)
    P['fc_w'] = take((c2, c2)); P['fc_b'] = take((c2,))
    P['pdcsa_w'] = take((1, 1, 3, 3)); P['pdcsa_bn'] = bn(1)
    P['d0'] = dict(w1=take((1, 2, 1, 3)), b1=take((1,)), bn=bn(1),
                   w2=take((1, 1, 3, 1)), b2=take((1,)))
    P['d1'] = dict(w1=take((1, 1, 1, 1)), b1=take((1,)), bn=bn(1),
                   w2=take((1, 1, 1, 1)), b2=take((1,)))
    P['d2'] = dict(w1=take((1, 1, 1, 5)), b1=take((1,)), bn=bn(1),
                   w2=take((1, 1, 5, 1)), b2=take((1,)))
    P['d3'] = dict(w1=take((1, 1, 1, 9)), b1=take((1,)), bn=bn(1),
                   w2=take((1, 1, 9, 1)), b2=take((1,)))
    P['cv2_w'] = take((1, 2, 3, 3))
    P['fusion_w'] = take((1, 3, 1, 1))
    return P


# ------------------------------------ main ------------------------------------

if __name__ == "__main__":
    B, C1_IN, C2, H, W = 2, 16, 8, 16, 16
    key = jax.random.PRNGKey(0)
    k0, k1, k2, k3 = jax.random.split(key, 4)
    x0 = jax.random.normal(k0, (B, C2, H, W), jnp.float32)
    x1 = jax.random.normal(k1, (B, C2, H, W), jnp.float32)
    x2 = jax.random.normal(k2, (B, C1_IN), jnp.float32)
    x3 = jax.random.normal(k3, (B, 1, 2 * H, 2 * W), jnp.float32)
    P = init_params(C1_IN, C2, jax.random.PRNGKey(42))

    # weight-derived constants (~50 KB) built once per (weights, H, W); in
    # production these would be cached alongside the module parameters.
    consts = build_constants(P, H, W, 2 * H, 2 * W)
    consts = jax.tree_util.tree_map(jax.block_until_ready, consts)

    fwd = jax.jit(dcmsa_pallas)
    y0, y1, dcca, dcsa = fwd(x0, x1, x2, x3, consts)
    jax.block_until_ready((y0, y1, dcca, dcsa))

    with jax.default_matmul_precision("highest"):
        r0, r1, rdcca, rdcsa = dcmsa_ref(x0, x1, x2, x3, P)
    jax.block_until_ready((r0, r1, rdcca, rdcsa))

    # bf16 MXU operands with f32 accumulation -> slightly looser tolerance.
    tol = dict(rtol=3e-2, atol=3e-2)
    np.testing.assert_allclose(np.asarray(y0), np.asarray(r0), **tol)
    np.testing.assert_allclose(np.asarray(y1), np.asarray(r1), **tol)
    np.testing.assert_allclose(np.asarray(dcca), np.asarray(rdcca), **tol)
    np.testing.assert_allclose(np.asarray(dcsa), np.asarray(rdcsa), **tol)

    print("KERNEL_OK")
</pallas_src>

<mosaic_0001>
module attributes {stable_mosaic.version = 11 : i64} {
  func.func @dcmsa_kernel(%arg0: i32, %arg1: memref<1x8x256xf32, #tpu.memory_space<vmem>>, %arg2: memref<1x8x256xf32, #tpu.memory_space<vmem>>, %arg3: memref<1x1x16xf32, #tpu.memory_space<vmem>>, %arg4: memref<1x32x32xf32, #tpu.memory_space<vmem>>, %arg5: memref<8x16xf32, #tpu.memory_space<vmem>>, %arg6: memref<8x1xf32, #tpu.memory_space<vmem>>, %arg7: memref<8x1xf32, #tpu.memory_space<vmem>>, %arg8: memref<8x1xf32, #tpu.memory_space<vmem>>, %arg9: memref<8x1xf32, #tpu.memory_space<vmem>>, %arg10: memref<8x1xf32, #tpu.memory_space<vmem>>, %arg11: memref<8x8xf32, #tpu.memory_space<vmem>>, %arg12: memref<1x8xf32, #tpu.memory_space<vmem>>, %arg13: memref<3x16x32xbf16, #tpu.memory_space<vmem>>, %arg14: memref<3x32x16xbf16, #tpu.memory_space<vmem>>, %arg15: memref<2x16x16xbf16, #tpu.memory_space<vmem>>, %arg16: memref<16x16xbf16, #tpu.memory_space<vmem>>, %arg17: memref<6x16x16xbf16, #tpu.memory_space<vmem>>, %arg18: memref<3x16x16xbf16, #tpu.memory_space<vmem>>, %arg19: memref<16x16xbf16, #tpu.memory_space<vmem>>, %arg20: memref<16x16xbf16, #tpu.memory_space<vmem>>, %arg21: memref<16x16xbf16, #tpu.memory_space<vmem>>, %arg22: memref<16x16xbf16, #tpu.memory_space<vmem>>, %arg23: memref<256x16xbf16, #tpu.memory_space<vmem>>, %arg24: memref<16x256xbf16, #tpu.memory_space<vmem>>, %arg25: memref<16x256xf32, #tpu.memory_space<vmem>>, %arg26: memref<26xf32, #tpu.memory_space<smem>>, %arg27: memref<1x8x256xf32, #tpu.memory_space<vmem>>, %arg28: memref<1x8x256xf32, #tpu.memory_space<vmem>>, %arg29: memref<1x8x1xf32, #tpu.memory_space<vmem>>, %arg30: memref<1x16x16xf32, #tpu.memory_space<vmem>>) attributes {dimension_semantics = [#tpu.dimension_semantics<parallel>], iteration_bounds = array<i64: 2>, scalar_prefetch = 0 : i64, scratch_operands = 0 : i64, tpu.core_type = #tpu.core_type<tc>, window_params = [{transform_indices = @transform_0, window_bounds = array<i64: 1, 8, 256>}, {transform_indices = @transform_1, window_bounds = array<i64: 1, 8, 256>}, {transform_indices = @transform_2, window_bounds = array<i64: 1, 1, 16>}, {transform_indices = @transform_3, window_bounds = array<i64: 1, 32, 32>}, {pipeline_mode = #tpu.pipeline_mode<synchronous>, transform_indices = @transform_4, window_bounds = array<i64: 8, 16>}, {pipeline_mode = #tpu.pipeline_mode<synchronous>, transform_indices = @transform_5, window_bounds = array<i64: 8, 1>}, {pipeline_mode = #tpu.pipeline_mode<synchronous>, transform_indices = @transform_6, window_bounds = array<i64: 8, 1>}, {pipeline_mode = #tpu.pipeline_mode<synchronous>, transform_indices = @transform_7, window_bounds = array<i64: 8, 1>}, {pipeline_mode = #tpu.pipeline_mode<synchronous>, transform_indices = @transform_8, window_bounds = array<i64: 8, 1>}, {pipeline_mode = #tpu.pipeline_mode<synchronous>, transform_indices = @transform_9, window_bounds = array<i64: 8, 1>}, {pipeline_mode = #tpu.pipeline_mode<synchronous>, transform_indices = @transform_10, window_bounds = array<i64: 8, 8>}, {pipeline_mode = #tpu.pipeline_mode<synchronous>, transform_indices = @transform_11, window_bounds = array<i64: 1, 8>}, {pipeline_mode = #tpu.pipeline_mode<synchronous>, transform_indices = @transform_12, window_bounds = array<i64: 3, 16, 32>}, {pipeline_mode = #tpu.pipeline_mode<synchronous>, transform_indices = @transform_13, window_bounds = array<i64: 3, 32, 16>}, {pipeline_mode = #tpu.pipeline_mode<synchronous>, transform_indices = @transform_14, window_bounds = array<i64: 2, 16, 16>}, {pipeline_mode = #tpu.pipeline_mode<synchronous>, transform_indices = @transform_15, window_bounds = array<i64: 16, 16>}, {pipeline_mode = #tpu.pipeline_mode<synchronous>, transform_indices = @transform_16, window_bounds = array<i64: 6, 16, 16>}, {pipeline_mode = #tpu.pipeline_mode<synchronous>, transform_indices = @transform_17, window_bounds = array<i64: 3, 16, 16>}, {pipeline_mode = #tpu.pipeline_mode<synchronous>, transform_indices = @transform_18, window_bounds = array<i64: 16, 16>}, {pipeline_mode = #tpu.pipeline_mode<synchronous>, transform_indices = @transform_19, window_bounds = array<i64: 16, 16>}, {pipeline_mode = #tpu.pipeline_mode<synchronous>, transform_indices = @transform_20, window_bounds = array<i64: 16, 16>}, {pipeline_mode = #tpu.pipeline_mode<synchronous>, transform_indices = @transform_21, window_bounds = array<i64: 16, 16>}, {pipeline_mode = #tpu.pipeline_mode<synchronous>, transform_indices = @transform_22, window_bounds = array<i64: 256, 16>}, {pipeline_mode = #tpu.pipeline_mode<synchronous>, transform_indices = @transform_23, window_bounds = array<i64: 16, 256>}, {pipeline_mode = #tpu.pipeline_mode<synchronous>, transform_indices = @transform_24, window_bounds = array<i64: 16, 256>}, {transform_indices = @transform_25, window_bounds = array<i64: 26>}, {transform_indices = @transform_26, window_bounds = array<i64: 1, 8, 256>}, {transform_indices = @transform_27, window_bounds = array<i64: 1, 8, 256>}, {transform_indices = @transform_28, window_bounds = array<i64: 1, 8, 1>}, {transform_indices = @transform_29, window_bounds = array<i64: 1, 16, 16>}]} {
    %c0 = arith.constant 0 : index
    %c0_0 = arith.constant 0 : index
    %c0_1 = arith.constant 0 : index
    %0 = vector.load %arg1[%c0, %c0_0, %c0_1] : memref<1x8x256xf32, #tpu.memory_space<vmem>>, vector<1x8x256xf32>
    %1 = vector.shape_cast %0 : vector<1x8x256xf32> to vector<8x256xf32>
    %c0_2 = arith.constant 0 : index
    %c0_3 = arith.constant 0 : index
    %c0_4 = arith.constant 0 : index
    %2 = vector.load %arg2[%c0_2, %c0_3, %c0_4] : memref<1x8x256xf32, #tpu.memory_space<vmem>>, vector<1x8x256xf32>
    %3 = vector.shape_cast %2 : vector<1x8x256xf32> to vector<8x256xf32>
    %c0_5 = arith.constant 0 : index
    %c0_6 = arith.constant 0 : index
    %4 = vector.load %arg5[%c0_5, %c0_6] : memref<8x16xf32, #tpu.memory_space<vmem>>, vector<8x16xf32>
    %c0_7 = arith.constant 0 : index
    %c0_8 = arith.constant 0 : index
    %c0_9 = arith.constant 0 : index
    %5 = vector.load %arg3[%c0_7, %c0_8, %c0_9] : memref<1x1x16xf32, #tpu.memory_space<vmem>>, vector<1x1x16xf32>
    %6 = vector.shape_cast %5 : vector<1x1x16xf32> to vector<1x16xf32>
    %7 = vector.broadcast %6 : vector<1x16xf32> to vector<8x16xf32>
    %8 = arith.mulf %4, %7 : vector<8x16xf32>
    %cst = arith.constant dense<0.000000e+00> : vector<8xf32>
    %9 = vector.multi_reduction <add>, %8, %cst [1] : vector<8x16xf32> to vector<8xf32>
    %10 = vector.shape_cast %9 : vector<8xf32> to vector<8x1xf32>
    %c0_10 = arith.constant 0 : index
    %c0_11 = arith.constant 0 : index
    %11 = vector.load %arg6[%c0_10, %c0_11] : memref<8x1xf32, #tpu.memory_space<vmem>>, vector<8x1xf32>
    %12 = arith.addf %10, %11 : vector<8x1xf32>
    %cst_12 = arith.constant dense<0.000000e+00> : vector<1xf32>
    %13 = vector.multi_reduction <add>, %12, %cst_12 [0] : vector<8x1xf32> to vector<1xf32>
    %14 = vector.shape_cast %13 : vector<1xf32> to vector<1x1xf32>
    %cst_13 = arith.constant 8.000000e+00 : f32
    %15 = vector.broadcast %cst_13 : f32 to vector<1x1xf32>
    %16 = arith.divf %14, %15 : vector<1x1xf32>
    %17 = vector.broadcast %16 : vector<1x1xf32> to vector<8x1xf32>
    %18 = arith.subf %12, %17 : vector<8x1xf32>
    %19 = arith.mulf %18, %18 : vector<8x1xf32>
    %cst_14 = arith.constant dense<0.000000e+00> : vector<1xf32>
    %20 = vector.multi_reduction <add>, %19, %cst_14 [0] : vector<8x1xf32> to vector<1xf32>
    %21 = vector.shape_cast %20 : vector<1xf32> to vector<1x1xf32>
    %cst_15 = arith.constant 8.000000e+00 : f32
    %22 = vector.broadcast %cst_15 : f32 to vector<1x1xf32>
    %23 = arith.divf %21, %22 : vector<1x1xf32>
    %24 = vector.broadcast %16 : vector<1x1xf32> to vector<8x1xf32>
    %25 = arith.subf %12, %24 : vector<8x1xf32>
    %cst_16 = arith.constant 9.99999974E-6 : f32
    %26 = vector.broadcast %cst_16 : f32 to vector<1x1xf32>
    %27 = arith.addf %23, %26 : vector<1x1xf32>
    %28 = math.rsqrt %27 : vector<1x1xf32>
    %29 = vector.broadcast %28 : vector<1x1xf32> to vector<8x1xf32>
    %30 = arith.mulf %25, %29 : vector<8x1xf32>
    %c0_17 = arith.constant 0 : index
    %c0_18 = arith.constant 0 : index
    %31 = vector.load %arg7[%c0_17, %c0_18] : memref<8x1xf32, #tpu.memory_space<vmem>>, vector<8x1xf32>
    %32 = arith.mulf %30, %31 : vector<8x1xf32>
    %c0_19 = arith.constant 0 : index
    %c0_20 = arith.constant 0 : index
    %33 = vector.load %arg8[%c0_19, %c0_20] : memref<8x1xf32, #tpu.memory_space<vmem>>, vector<8x1xf32>
    %34 = arith.addf %32, %33 : vector<8x1xf32>
    %cst_21 = arith.constant 0.000000e+00 : f32
    %35 = vector.broadcast %cst_21 : f32 to vector<8x1xf32>
    %36 = arith.maximumf %34, %35 : vector<8x1xf32>
    %cst_22 = arith.constant dense<0.000000e+00> : vector<8xf32>
    %37 = vector.multi_reduction <add>, %1, %cst_22 [1] : vector<8x256xf32> to vector<8xf32>
    %38 = vector.shape_cast %37 : vector<8xf32> to vector<8x1xf32>
    %cst_23 = arith.constant 3.906250e-03 : f32
    %39 = vector.broadcast %cst_23 : f32 to vector<8x1xf32>
    %40 = arith.mulf %38, %39 : vector<8x1xf32>
    %c0_24 = arith.constant 0 : index
    %41 = memref.load %arg26[%c0_24] : memref<26xf32, #tpu.memory_space<smem>>
    %42 = vector.broadcast %41 : f32 to vector<8x1xf32>
    %43 = arith.mulf %40, %42 : vector<8x1xf32>
    %c1 = arith.constant 1 : index
    %44 = memref.load %arg26[%c1] : memref<26xf32, #tpu.memory_space<smem>>
    %45 = vector.broadcast %44 : f32 to vector<8x1xf32>
    %46 = arith.mulf %36, %45 : vector<8x1xf32>
    %47 = arith.addf %43, %46 : vector<8x1xf32>
    %c2 = arith.constant 2 : index
    %48 = memref.load %arg26[%c2] : memref<26xf32, #tpu.memory_space<smem>>
    %49 = vector.broadcast %48 : f32 to vector<8x1xf32>
    %50 = arith.addf %47, %49 : vector<8x1xf32>
    %cst_25 = arith.constant dense<0.000000e+00> : vector<1xf32>
    %51 = vector.multi_reduction <add>, %50, %cst_25 [0] : vector<8x1xf32> to vector<1xf32>
    %52 = vector.shape_cast %51 : vector<1xf32> to vector<1x1xf32>
    %cst_26 = arith.constant 8.000000e+00 : f32
    %53 = vector.broadcast %cst_26 : f32 to vector<1x1xf32>
    %54 = arith.divf %52, %53 : vector<1x1xf32>
    %55 = vector.broadcast %54 : vector<1x1xf32> to vector<8x1xf32>
    %56 = arith.subf %50, %55 : vector<8x1xf32>
    %57 = arith.mulf %56, %56 : vector<8x1xf32>
    %cst_27 = arith.constant dense<0.000000e+00> : vector<1xf32>
    %58 = vector.multi_reduction <add>, %57, %cst_27 [0] : vector<8x1xf32> to vector<1xf32>
    %59 = vector.shape_cast %58 : vector<1xf32> to vector<1x1xf32>
    %cst_28 = arith.constant 8.000000e+00 : f32
    %60 = vector.broadcast %cst_28 : f32 to vector<1x1xf32>
    %61 = arith.divf %59, %60 : vector<1x1xf32>
    %62 = vector.broadcast %54 : vector<1x1xf32> to vector<8x1xf32>
    %63 = arith.subf %50, %62 : vector<8x1xf32>
    %cst_29 = arith.constant 9.99999974E-6 : f32
    %64 = vector.broadcast %cst_29 : f32 to vector<1x1xf32>
    %65 = arith.addf %61, %64 : vector<1x1xf32>
    %66 = math.rsqrt %65 : vector<1x1xf32>
    %67 = vector.broadcast %66 : vector<1x1xf32> to vector<8x1xf32>
    %68 = arith.mulf %63, %67 : vector<8x1xf32>
    %c0_30 = arith.constant 0 : index
    %c0_31 = arith.constant 0 : index
    %69 = vector.load %arg9[%c0_30, %c0_31] : memref<8x1xf32, #tpu.memory_space<vmem>>, vector<8x1xf32>
    %70 = arith.mulf %68, %69 : vector<8x1xf32>
    %c0_32 = arith.constant 0 : index
    %c0_33 = arith.constant 0 : index
    %71 = vector.load %arg10[%c0_32, %c0_33] : memref<8x1xf32, #tpu.memory_space<vmem>>, vector<8x1xf32>
    %72 = arith.addf %70, %71 : vector<8x1xf32>
    %cst_34 = arith.constant 0.000000e+00 : f32
    %73 = vector.broadcast %cst_34 : f32 to vector<8x1xf32>
    %74 = arith.maximumf %72, %73 : vector<8x1xf32>
    %c0_35 = arith.constant 0 : index
    %c0_36 = arith.constant 0 : index
    %75 = vector.load %arg11[%c0_35, %c0_36] : memref<8x8xf32, #tpu.memory_space<vmem>>, vector<8x8xf32>
    %76 = vector.broadcast %74 : vector<8x1xf32> to vector<8x8xf32>
    %77 = arith.mulf %75, %76 : vector<8x8xf32>
    %cst_37 = arith.constant dense<0.000000e+00> : vector<8xf32>
    %78 = vector.multi_reduction <add>, %77, %cst_37 [0] : vector<8x8xf32> to vector<8xf32>
    %79 = vector.shape_cast %78 : vector<8xf32> to vector<1x8xf32>
    %c0_38 = arith.constant 0 : index
    %c0_39 = arith.constant 0 : index
    %80 = vector.load %arg12[%c0_38, %c0_39] : memref<1x8xf32, #tpu.memory_space<vmem>>, vector<1x8xf32>
    %81 = arith.addf %79, %80 : vector<1x8xf32>
    %82 = arith.negf %81 : vector<1x8xf32>
    %83 = math.exp %82 : vector<1x8xf32>
    %cst_40 = arith.constant 1.000000e+00 : f32
    %84 = vector.broadcast %cst_40 : f32 to vector<1x8xf32>
    %85 = arith.addf %84, %83 : vector<1x8xf32>
    %86 = arith.divf %84, %85 : vector<1x8xf32>
    %87 = tpu.iota {dimensions = array<i32: 0>} : vector<8x8xi32>
    %88 = tpu.iota {dimensions = array<i32: 1>} : vector<8x8xi32>
    %89 = arith.cmpi eq, %87, %88 : vector<8x8xi32>
    %90 = arith.extui %89 : vector<8x8xi1> to vector<8x8xi32>
    %91 = arith.sitofp %90 : vector<8x8xi32> to vector<8x8xf32>
    %92 = vector.broadcast %86 : vector<1x8xf32> to vector<8x8xf32>
    %93 = arith.mulf %91, %92 : vector<8x8xf32>
    %cst_41 = arith.constant dense<0.000000e+00> : vector<8xf32>
    %94 = vector.multi_reduction <add>, %93, %cst_41 [1] : vector<8x8xf32> to vector<8xf32>
    %95 = vector.shape_cast %94 : vector<8xf32> to vector<8x1xf32>
    %96 = vector.broadcast %95 : vector<8x1xf32> to vector<8x256xf32>
    %97 = arith.mulf %1, %96 : vector<8x256xf32>
    %98 = arith.mulf %40, %95 : vector<8x1xf32>
    %c0_42 = arith.constant 0 : index
    %c0_43 = arith.constant 0 : index
    %c0_44 = arith.constant 0 : index
    %99 = vector.load %arg29[%c0_42, %c0_43, %c0_44] : memref<1x8x1xf32, #tpu.memory_space<vmem>>, vector<1x8x1xf32>
    %100 = vector.shape_cast %99 : vector<1x8x1xf32> to vector<8x1xf32>
    %101 = vector.shape_cast %98 : vector<8x1xf32> to vector<1x8x1xf32>
    tpu.vector_store %arg29[%c0_42, %c0_43, %c0_44], %101 {strides = array<i32>} : memref<1x8x1xf32, #tpu.memory_space<vmem>>, vector<1x8x1xf32>,
    %c0_45 = arith.constant 0 : index
    %c0_46 = arith.constant 0 : index
    %c0_47 = arith.constant 0 : index
    %102 = vector.load %arg4[%c0_45, %c0_46, %c0_47] : memref<1x32x32xf32, #tpu.memory_space<vmem>>, vector<1x32x32xf32>
    %103 = vector.shape_cast %102 : vector<1x32x32xf32> to vector<32x32xf32>
    %cst_48 = arith.constant 0.000000e+00 : f32
    %104 = vector.broadcast %cst_48 : f32 to vector<16x16xf32>
    %c0_49 = arith.constant 0 : index
    %c0_50 = arith.constant 0 : index
    %c0_51 = arith.constant 0 : index
    %105 = vector.load %arg13[%c0_49, %c0_50, %c0_51] : memref<3x16x32xbf16, #tpu.memory_space<vmem>>, vector<1x16x32xbf16>
    %106 = vector.shape_cast %105 : vector<1x16x32xbf16> to vector<16x32xbf16>
    %107 = arith.truncf %103 : vector<32x32xf32> to vector<32x32xbf16>
    %cst_52 = arith.constant dense<0.000000e+00> : vector<16x32xf32>
    %108 = tpu.matmul %106, %107, %cst_52 {dimension_numbers = #tpu.dot_dimension_numbers<[1], [0], [0], [1], [0, 0, 1, 1], [], []>} : vector<16x32xbf16>, vector<32x32xbf16>, vector<16x32xf32> -> vector<16x32xf32>
    %c0_53 = arith.constant 0 : index
    %c0_54 = arith.constant 0 : index
    %c0_55 = arith.constant 0 : index
    %109 = vector.load %arg14[%c0_53, %c0_54, %c0_55] : memref<3x32x16xbf16, #tpu.memory_space<vmem>>, vector<1x32x16xbf16>
    %110 = vector.shape_cast %109 : vector<1x32x16xbf16> to vector<32x16xbf16>
    %111 = arith.truncf %108 : vector<16x32xf32> to vector<16x32xbf16>
    %cst_56 = arith.constant dense<0.000000e+00> : vector<16x16xf32>
    %112 = tpu.matmul %111, %110, %cst_56 {dimension_numbers = #tpu.dot_dimension_numbers<[1], [0], [0], [1], [0, 0, 1, 1], [], []>} : vector<16x32xbf16>, vector<32x16xbf16>, vector<16x16xf32> -> vector<16x16xf32>
    %113 = arith.addf %104, %112 : vector<16x16xf32>
    %c1_57 = arith.constant 1 : index
    %c0_58 = arith.constant 0 : index
    %c0_59 = arith.constant 0 : index
    %114 = vector.load %arg13[%c1_57, %c0_58, %c0_59] : memref<3x16x32xbf16, #tpu.memory_space<vmem>>, vector<1x16x32xbf16>
    %115 = vector.shape_cast %114 : vector<1x16x32xbf16> to vector<16x32xbf16>
    %116 = arith.truncf %103 : vector<32x32xf32> to vector<32x32xbf16>
    %cst_60 = arith.constant dense<0.000000e+00> : vector<16x32xf32>
    %117 = tpu.matmul %115, %116, %cst_60 {dimension_numbers = #tpu.dot_dimension_numbers<[1], [0], [0], [1], [0, 0, 1, 1], [], []>} : vector<16x32xbf16>, vector<32x32xbf16>, vector<16x32xf32> -> vector<16x32xf32>
    %c1_61 = arith.constant 1 : index
    %c0_62 = arith.constant 0 : index
    %c0_63 = arith.constant 0 : index
    %118 = vector.load %arg14[%c1_61, %c0_62, %c0_63] : memref<3x32x16xbf16, #tpu.memory_space<vmem>>, vector<1x32x16xbf16>
    %119 = vector.shape_cast %118 : vector<1x32x16xbf16> to vector<32x16xbf16>
    %120 = arith.truncf %117 : vector<16x32xf32> to vector<16x32xbf16>
    %cst_64 = arith.constant dense<0.000000e+00> : vector<16x16xf32>
    %121 = tpu.matmul %120, %119, %cst_64 {dimension_numbers = #tpu.dot_dimension_numbers<[1], [0], [0], [1], [0, 0, 1, 1], [], []>} : vector<16x32xbf16>, vector<32x16xbf16>, vector<16x16xf32> -> vector<16x16xf32>
    %122 = arith.addf %113, %121 : vector<16x16xf32>
    %c2_65 = arith.constant 2 : index
    %c0_66 = arith.constant 0 : index
    %c0_67 = arith.constant 0 : index
    %123 = vector.load %arg13[%c2_65, %c0_66, %c0_67] : memref<3x16x32xbf16, #tpu.memory_space<vmem>>, vector<1x16x32xbf16>
    %124 = vector.shape_cast %123 : vector<1x16x32xbf16> to vector<16x32xbf16>
    %125 = arith.truncf %103 : vector<32x32xf32> to vector<32x32xbf16>
    %cst_68 = arith.constant dense<0.000000e+00> : vector<16x32xf32>
    %126 = tpu.matmul %124, %125, %cst_68 {dimension_numbers = #tpu.dot_dimension_numbers<[1], [0], [0], [1], [0, 0, 1, 1], [], []>} : vector<16x32xbf16>, vector<32x32xbf16>, vector<16x32xf32> -> vector<16x32xf32>
    %c2_69 = arith.constant 2 : index
    %c0_70 = arith.constant 0 : index
    %c0_71 = arith.constant 0 : index
    %127 = vector.load %arg14[%c2_69, %c0_70, %c0_71] : memref<3x32x16xbf16, #tpu.memory_space<vmem>>, vector<1x32x16xbf16>
    %128 = vector.shape_cast %127 : vector<1x32x16xbf16> to vector<32x16xbf16>
    %129 = arith.truncf %126 : vector<16x32xf32> to vector<16x32xbf16>
    %cst_72 = arith.constant dense<0.000000e+00> : vector<16x16xf32>
    %130 = tpu.matmul %129, %128, %cst_72 {dimension_numbers = #tpu.dot_dimension_numbers<[1], [0], [0], [1], [0, 0, 1, 1], [], []>} : vector<16x32xbf16>, vector<32x16xbf16>, vector<16x16xf32> -> vector<16x16xf32>
    %131 = arith.addf %122, %130 : vector<16x16xf32>
    %c3 = arith.constant 3 : index
    %132 = memref.load %arg26[%c3] : memref<26xf32, #tpu.memory_space<smem>>
    %133 = vector.broadcast %132 : f32 to vector<16x16xf32>
    %134 = arith.mulf %131, %133 : vector<16x16xf32>
    %c4 = arith.constant 4 : index
    %135 = memref.load %arg26[%c4] : memref<26xf32, #tpu.memory_space<smem>>
    %136 = vector.broadcast %135 : f32 to vector<16x16xf32>
    %137 = arith.addf %134, %136 : vector<16x16xf32>
    %138 = arith.negf %137 : vector<16x16xf32>
    %139 = math.exp %138 : vector<16x16xf32>
    %cst_73 = arith.constant 1.000000e+00 : f32
    %140 = vector.broadcast %cst_73 : f32 to vector<16x16xf32>
    %141 = arith.addf %140, %139 : vector<16x16xf32>
    %142 = arith.divf %140, %141 : vector<16x16xf32>
    %143 = arith.mulf %137, %142 : vector<16x16xf32>
    %cst_74 = arith.constant dense<0.000000e+00> : vector<256xf32>
    %144 = vector.multi_reduction <add>, %97, %cst_74 [0] : vector<8x256xf32> to vector<256xf32>
    %145 = vector.shape_cast %144 : vector<256xf32> to vector<1x256xf32>
    %cst_75 = arith.constant dense<0.000000e+00> : vector<256xf32>
    %146 = vector.multi_reduction <add>, %3, %cst_75 [0] : vector<8x256xf32> to vector<256xf32>
    %147 = vector.shape_cast %146 : vector<256xf32> to vector<1x256xf32>
    %148 = arith.addf %145, %147 : vector<1x256xf32>
    %cst_76 = arith.constant 6.250000e-02 : f32
    %149 = vector.broadcast %cst_76 : f32 to vector<1x256xf32>
    %150 = arith.mulf %148, %149 : vector<1x256xf32>
    %cst_77 = arith.constant dense<0xFF800000> : vector<256xf32>
    %151 = vector.multi_reduction <maximumf>, %97, %cst_77 [0] : vector<8x256xf32> to vector<256xf32>
    %152 = vector.shape_cast %151 : vector<256xf32> to vector<1x256xf32>
    %cst_78 = arith.constant dense<0xFF800000> : vector<256xf32>
    %153 = vector.multi_reduction <maximumf>, %3, %cst_78 [0] : vector<8x256xf32> to vector<256xf32>
    %154 = vector.shape_cast %153 : vector<256xf32> to vector<1x256xf32>
    %155 = arith.maximumf %152, %154 : vector<1x256xf32>
    %c0_79 = arith.constant 0 : index
    %c0_80 = arith.constant 0 : index
    %156 = vector.load %arg25[%c0_79, %c0_80] : memref<16x256xf32, #tpu.memory_space<vmem>>, vector<16x256xf32>
    %157 = vector.broadcast %150 : vector<1x256xf32> to vector<16x256xf32>
    %158 = arith.mulf %157, %156 : vector<16x256xf32>
    %cst_81 = arith.constant dense<0.000000e+00> : vector<16xf32>
    %159 = vector.multi_reduction <add>, %158, %cst_81 [1] : vector<16x256xf32> to vector<16xf32>
    %160 = vector.shape_cast %159 : vector<16xf32> to vector<16x1xf32>
    %cst_82 = arith.constant 6.250000e-02 : f32
    %161 = vector.broadcast %cst_82 : f32 to vector<16x1xf32>
    %162 = arith.mulf %160, %161 : vector<16x1xf32>
    %c0_83 = arith.constant 0 : index
    %c0_84 = arith.constant 0 : index
    %163 = vector.load %arg23[%c0_83, %c0_84] : memref<256x16xbf16, #tpu.memory_space<vmem>>, vector<256x16xbf16>
    %164 = arith.truncf %150 : vector<1x256xf32> to vector<1x256xbf16>
    %cst_85 = arith.constant dense<0.000000e+00> : vector<1x16xf32>
    %165 = tpu.matmul %164, %163, %cst_85 {dimension_numbers = #tpu.dot_dimension_numbers<[1], [0], [0], [1], [0, 0, 1, 1], [], []>} : vector<1x256xbf16>, vector<256x16xbf16>, vector<1x16xf32> -> vector<1x16xf32>
    %cst_86 = arith.constant 6.250000e-02 : f32
    %166 = vector.broadcast %cst_86 : f32 to vector<1x16xf32>
    %167 = arith.mulf %165, %166 : vector<1x16xf32>
    %168 = vector.broadcast %162 : vector<16x1xf32> to vector<16x16xf32>
    %169 = vector.broadcast %167 : vector<1x16xf32> to vector<16x16xf32>
    %170 = arith.addf %168, %169 : vector<16x16xf32>
    %171 = vector.broadcast %155 : vector<1x256xf32> to vector<16x256xf32>
    %172 = arith.mulf %171, %156 : vector<16x256xf32>
    %cst_87 = arith.constant dense<0.000000e+00> : vector<16xf32>
    %173 = vector.multi_reduction <add>, %172, %cst_87 [1] : vector<16x256xf32> to vector<16xf32>
    %174 = vector.shape_cast %173 : vector<16xf32> to vector<16x1xf32>
    %cst_88 = arith.constant 6.250000e-02 : f32
    %175 = vector.broadcast %cst_88 : f32 to vector<16x1xf32>
    %176 = arith.mulf %174, %175 : vector<16x1xf32>
    %c0_89 = arith.constant 0 : index
    %c0_90 = arith.constant 0 : index
    %177 = vector.load %arg23[%c0_89, %c0_90] : memref<256x16xbf16, #tpu.memory_space<vmem>>, vector<256x16xbf16>
    %178 = arith.truncf %155 : vector<1x256xf32> to vector<1x256xbf16>
    %cst_91 = arith.constant dense<0.000000e+00> : vector<1x16xf32>
    %179 = tpu.matmul %178, %177, %cst_91 {dimension_numbers = #tpu.dot_dimension_numbers<[1], [0], [0], [1], [0, 0, 1, 1], [], []>} : vector<1x256xbf16>, vector<256x16xbf16>, vector<1x16xf32> -> vector<1x16xf32>
    %cst_92 = arith.constant 6.250000e-02 : f32
    %180 = vector.broadcast %cst_92 : f32 to vector<1x16xf32>
    %181 = arith.mulf %179, %180 : vector<1x16xf32>
    %182 = vector.broadcast %176 : vector<16x1xf32> to vector<16x16xf32>
    %183 = vector.broadcast %181 : vector<1x16xf32> to vector<16x16xf32>
    %184 = arith.addf %182, %183 : vector<16x16xf32>
    %c0_93 = arith.constant 0 : index
    %c0_94 = arith.constant 0 : index
    %c0_95 = arith.constant 0 : index
    %185 = vector.load %arg15[%c0_93, %c0_94, %c0_95] : memref<2x16x16xbf16, #tpu.memory_space<vmem>>, vector<1x16x16xbf16>
    %186 = vector.shape_cast %185 : vector<1x16x16xbf16> to vector<16x16xbf16>
    %187 = arith.truncf %170 : vector<16x16xf32> to vector<16x16xbf16>
    %cst_96 = arith.constant dense<0.000000e+00> : vector<16x16xf32>
    %188 = tpu.matmul %187, %186, %cst_96 {dimension_numbers = #tpu.dot_dimension_numbers<[1], [0], [0], [1], [0, 0, 1, 1], [], []>} : vector<16x16xbf16>, vector<16x16xbf16>, vector<16x16xf32> -> vector<16x16xf32>
    %c1_97 = arith.constant 1 : index
    %c0_98 = arith.constant 0 : index
    %c0_99 = arith.constant 0 : index
    %189 = vector.load %arg15[%c1_97, %c0_98, %c0_99] : memref<2x16x16xbf16, #tpu.memory_space<vmem>>, vector<1x16x16xbf16>
    %190 = vector.shape_cast %189 : vector<1x16x16xbf16> to vector<16x16xbf16>
    %191 = arith.truncf %184 : vector<16x16xf32> to vector<16x16xbf16>
    %cst_100 = arith.constant dense<0.000000e+00> : vector<16x16xf32>
    %192 = tpu.matmul %191, %190, %cst_100 {dimension_numbers = #tpu.dot_dimension_numbers<[1], [0], [0], [1], [0, 0, 1, 1], [], []>} : vector<16x16xbf16>, vector<16x16xbf16>, vector<16x16xf32> -> vector<16x16xf32>
    %193 = arith.addf %188, %192 : vector<16x16xf32>
    %c5 = arith.constant 5 : index
    %194 = memref.load %arg26[%c5] : memref<26xf32, #tpu.memory_space<smem>>
    %195 = vector.broadcast %194 : f32 to vector<16x16xf32>
    %196 = arith.addf %193, %195 : vector<16x16xf32>
    %c6 = arith.constant 6 : index
    %197 = memref.load %arg26[%c6] : memref<26xf32, #tpu.memory_space<smem>>
    %198 = vector.broadcast %197 : f32 to vector<16x16xf32>
    %199 = arith.mulf %196, %198 : vector<16x16xf32>
    %c7 = arith.constant 7 : index
    %200 = memref.load %arg26[%c7] : memref<26xf32, #tpu.memory_space<smem>>
    %201 = vector.broadcast %200 : f32 to vector<16x16xf32>
    %202 = arith.addf %199, %201 : vector<16x16xf32>
    %cst_101 = arith.constant 0.000000e+00 : f32
    %203 = vector.broadcast %cst_101 : f32 to vector<16x16xf32>
    %204 = arith.maximumf %202, %203 : vector<16x16xf32>
    %c0_102 = arith.constant 0 : index
    %c0_103 = arith.constant 0 : index
    %205 = vector.load %arg16[%c0_102, %c0_103] : memref<16x16xbf16, #tpu.memory_space<vmem>>, vector<16x16xbf16>
    %206 = arith.truncf %204 : vector<16x16xf32> to vector<16x16xbf16>
    %cst_104 = arith.constant dense<0.000000e+00> : vector<16x16xf32>
    %207 = tpu.matmul %205, %206, %cst_104 {dimension_numbers = #tpu.dot_dimension_numbers<[1], [0], [0], [1], [0, 0, 1, 1], [], []>} : vector<16x16xbf16>, vector<16x16xbf16>, vector<16x16xf32> -> vector<16x16xf32>
    %c8 = arith.constant 8 : index
    %208 = memref.load %arg26[%c8] : memref<26xf32, #tpu.memory_space<smem>>
    %209 = vector.broadcast %208 : f32 to vector<16x16xf32>
    %210 = arith.addf %207, %209 : vector<16x16xf32>
    %cst_105 = arith.constant 0.000000e+00 : f32
    %211 = vector.broadcast %cst_105 : f32 to vector<16x16xf32>
    %c0_106 = arith.constant 0 : index
    %c0_107 = arith.constant 0 : index
    %c0_108 = arith.constant 0 : index
    %212 = vector.load %arg17[%c0_106, %c0_107, %c0_108] : memref<6x16x16xbf16, #tpu.memory_space<vmem>>, vector<1x16x16xbf16>
    %213 = vector.shape_cast %212 : vector<1x16x16xbf16> to vector<16x16xbf16>
    %214 = arith.truncf %210 : vector<16x16xf32> to vector<16x16xbf16>
    %cst_109 = arith.constant dense<0.000000e+00> : vector<16x16xf32>
    %215 = tpu.matmul %214, %213, %cst_109 {dimension_numbers = #tpu.dot_dimension_numbers<[1], [0], [0], [1], [0, 0, 1, 1], [], []>} : vector<16x16xbf16>, vector<16x16xbf16>, vector<16x16xf32> -> vector<16x16xf32>
    %c3_110 = arith.constant 3 : index
    %c0_111 = arith.constant 0 : index
    %c0_112 = arith.constant 0 : index
    %216 = vector.load %arg17[%c3_110, %c0_111, %c0_112] : memref<6x16x16xbf16, #tpu.memory_space<vmem>>, vector<1x16x16xbf16>
    %217 = vector.shape_cast %216 : vector<1x16x16xbf16> to vector<16x16xbf16>
    %218 = arith.truncf %143 : vector<16x16xf32> to vector<16x16xbf16>
    %cst_113 = arith.constant dense<0.000000e+00> : vector<16x16xf32>
    %219 = tpu.matmul %218, %217, %cst_113 {dimension_numbers = #tpu.dot_dimension_numbers<[1], [0], [0], [1], [0, 0, 1, 1], [], []>} : vector<16x16xbf16>, vector<16x16xbf16>, vector<16x16xf32> -> vector<16x16xf32>
    %220 = arith.addf %215, %219 : vector<16x16xf32>
    %c0_114 = arith.constant 0 : index
    %c0_115 = arith.constant 0 : index
    %c0_116 = arith.constant 0 : index
    %221 = vector.load %arg18[%c0_114, %c0_115, %c0_116] : memref<3x16x16xbf16, #tpu.memory_space<vmem>>, vector<1x16x16xbf16>
    %222 = vector.shape_cast %221 : vector<1x16x16xbf16> to vector<16x16xbf16>
    %223 = arith.truncf %220 : vector<16x16xf32> to vector<16x16xbf16>
    %cst_117 = arith.constant dense<0.000000e+00> : vector<16x16xf32>
    %224 = tpu.matmul %222, %223, %cst_117 {dimension_numbers = #tpu.dot_dimension_numbers<[1], [0], [0], [1], [0, 0, 1, 1], [], []>} : vector<16x16xbf16>, vector<16x16xbf16>, vector<16x16xf32> -> vector<16x16xf32>
    %225 = arith.addf %211, %224 : vector<16x16xf32>
    %c1_118 = arith.constant 1 : index
    %c0_119 = arith.constant 0 : index
    %c0_120 = arith.constant 0 : index
    %226 = vector.load %arg17[%c1_118, %c0_119, %c0_120] : memref<6x16x16xbf16, #tpu.memory_space<vmem>>, vector<1x16x16xbf16>
    %227 = vector.shape_cast %226 : vector<1x16x16xbf16> to vector<16x16xbf16>
    %228 = arith.truncf %210 : vector<16x16xf32> to vector<16x16xbf16>
    %cst_121 = arith.constant dense<0.000000e+00> : vector<16x16xf32>
    %229 = tpu.matmul %228, %227, %cst_121 {dimension_numbers = #tpu.dot_dimension_numbers<[1], [0], [0], [1], [0, 0, 1, 1], [], []>} : vector<16x16xbf16>, vector<16x16xbf16>, vector<16x16xf32> -> vector<16x16xf32>
    %c4_122 = arith.constant 4 : index
    %c0_123 = arith.constant 0 : index
    %c0_124 = arith.constant 0 : index
    %230 = vector.load %arg17[%c4_122, %c0_123, %c0_124] : memref<6x16x16xbf16, #tpu.memory_space<vmem>>, vector<1x16x16xbf16>
    %231 = vector.shape_cast %230 : vector<1x16x16xbf16> to vector<16x16xbf16>
    %232 = arith.truncf %143 : vector<16x16xf32> to vector<16x16xbf16>
    %cst_125 = arith.constant dense<0.000000e+00> : vector<16x16xf32>
    %233 = tpu.matmul %232, %231, %cst_125 {dimension_numbers = #tpu.dot_dimension_numbers<[1], [0], [0], [1], [0, 0, 1, 1], [], []>} : vector<16x16xbf16>, vector<16x16xbf16>, vector<16x16xf32> -> vector<16x16xf32>
    %234 = arith.addf %229, %233 : vector<16x16xf32>
    %c1_126 = arith.constant 1 : index
    %c0_127 = arith.constant 0 : index
    %c0_128 = arith.constant 0 : index
    %235 = vector.load %arg18[%c1_126, %c0_127, %c0_128] : memref<3x16x16xbf16, #tpu.memory_space<vmem>>, vector<1x16x16xbf16>
    %236 = vector.shape_cast %235 : vector<1x16x16xbf16> to vector<16x16xbf16>
    %237 = arith.truncf %234 : vector<16x16xf32> to vector<16x16xbf16>
    %cst_129 = arith.constant dense<0.000000e+00> : vector<16x16xf32>
    %238 = tpu.matmul %236, %237, %cst_129 {dimension_numbers = #tpu.dot_dimension_numbers<[1], [0], [0], [1], [0, 0, 1, 1], [], []>} : vector<16x16xbf16>, vector<16x16xbf16>, vector<16x16xf32> -> vector<16x16xf32>
    %239 = arith.addf %225, %238 : vector<16x16xf32>
    %c2_130 = arith.constant 2 : index
    %c0_131 = arith.constant 0 : index
    %c0_132 = arith.constant 0 : index
    %240 = vector.load %arg17[%c2_130, %c0_131, %c0_132] : memref<6x16x16xbf16, #tpu.memory_space<vmem>>, vector<1x16x16xbf16>
    %241 = vector.shape_cast %240 : vector<1x16x16xbf16> to vector<16x16xbf16>
    %242 = arith.truncf %210 : vector<16x16xf32> to vector<16x16xbf16>
    %cst_133 = arith.constant dense<0.000000e+00> : vector<16x16xf32>
    %243 = tpu.matmul %242, %241, %cst_133 {dimension_numbers = #tpu.dot_dimension_numbers<[1], [0], [0], [1], [0, 0, 1, 1], [], []>} : vector<16x16xbf16>, vector<16x16xbf16>, vector<16x16xf32> -> vector<16x16xf32>
    %c5_134 = arith.constant 5 : index
    %c0_135 = arith.constant 0 : index
    %c0_136 = arith.constant 0 : index
    %244 = vector.load %arg17[%c5_134, %c0_135, %c0_136] : memref<6x16x16xbf16, #tpu.memory_space<vmem>>, vector<1x16x16xbf16>
    %245 = vector.shape_cast %244 : vector<1x16x16xbf16> to vector<16x16xbf16>
    %246 = arith.truncf %143 : vector<16x16xf32> to vector<16x16xbf16>
    %cst_137 = arith.constant dense<0.000000e+00> : vector<16x16xf32>
    %247 = tpu.matmul %246, %245, %cst_137 {dimension_numbers = #tpu.dot_dimension_numbers<[1], [0], [0], [1], [0, 0, 1, 1], [], []>} : vector<16x16xbf16>, vector<16x16xbf16>, vector<16x16xf32> -> vector<16x16xf32>
    %248 = arith.addf %243, %247 : vector<16x16xf32>
    %c2_138 = arith.constant 2 : index
    %c0_139 = arith.constant 0 : index
    %c0_140 = arith.constant 0 : index
    %249 = vector.load %arg18[%c2_138, %c0_139, %c0_140] : memref<3x16x16xbf16, #tpu.memory_space<vmem>>, vector<1x16x16xbf16>
    %250 = vector.shape_cast %249 : vector<1x16x16xbf16> to vector<16x16xbf16>
    %251 = arith.truncf %248 : vector<16x16xf32> to vector<16x16xbf16>
    %cst_141 = arith.constant dense<0.000000e+00> : vector<16x16xf32>
    %252 = tpu.matmul %250, %251, %cst_141 {dimension_numbers = #tpu.dot_dimension_numbers<[1], [0], [0], [1], [0, 0, 1, 1], [], []>} : vector<16x16xbf16>, vector<16x16xbf16>, vector<16x16xf32> -> vector<16x16xf32>
    %253 = arith.addf %239, %252 : vector<16x16xf32>
    %c9 = arith.constant 9 : index
    %254 = memref.load %arg26[%c9] : memref<26xf32, #tpu.memory_space<smem>>
    %255 = vector.broadcast %254 : f32 to vector<16x16xf32>
    %256 = arith.mulf %253, %255 : vector<16x16xf32>
    %c10 = arith.constant 10 : index
    %257 = memref.load %arg26[%c10] : memref<26xf32, #tpu.memory_space<smem>>
    %258 = vector.broadcast %257 : f32 to vector<16x16xf32>
    %259 = arith.addf %256, %258 : vector<16x16xf32>
    %c11 = arith.constant 11 : index
    %260 = memref.load %arg26[%c11] : memref<26xf32, #tpu.memory_space<smem>>
    %261 = vector.broadcast %260 : f32 to vector<16x16xf32>
    %262 = arith.mulf %259, %261 : vector<16x16xf32>
    %c12 = arith.constant 12 : index
    %263 = memref.load %arg26[%c12] : memref<26xf32, #tpu.memory_space<smem>>
    %264 = vector.broadcast %263 : f32 to vector<16x16xf32>
    %265 = arith.addf %262, %264 : vector<16x16xf32>
    %cst_142 = arith.constant 0.000000e+00 : f32
    %266 = vector.broadcast %cst_142 : f32 to vector<16x16xf32>
    %267 = arith.maximumf %265, %266 : vector<16x16xf32>
    %c13 = arith.constant 13 : index
    %268 = memref.load %arg26[%c13] : memref<26xf32, #tpu.memory_space<smem>>
    %269 = vector.broadcast %268 : f32 to vector<16x16xf32>
    %270 = arith.mulf %267, %269 : vector<16x16xf32>
    %c14 = arith.constant 14 : index
    %271 = memref.load %arg26[%c14] : memref<26xf32, #tpu.memory_space<smem>>
    %272 = vector.broadcast %271 : f32 to vector<16x16xf32>
    %273 = arith.addf %270, %272 : vector<16x16xf32>
    %c0_143 = arith.constant 0 : index
    %c0_144 = arith.constant 0 : index
    %274 = vector.load %arg19[%c0_143, %c0_144] : memref<16x16xbf16, #tpu.memory_space<vmem>>, vector<16x16xbf16>
    %275 = arith.truncf %253 : vector<16x16xf32> to vector<16x16xbf16>
    %cst_145 = arith.constant dense<0.000000e+00> : vector<16x16xf32>
    %276 = tpu.matmul %275, %274, %cst_145 {dimension_numbers = #tpu.dot_dimension_numbers<[1], [0], [0], [1], [0, 0, 1, 1], [], []>} : vector<16x16xbf16>, vector<16x16xbf16>, vector<16x16xf32> -> vector<16x16xf32>
    %c15 = arith.constant 15 : index
    %277 = memref.load %arg26[%c15] : memref<26xf32, #tpu.memory_space<smem>>
    %278 = vector.broadcast %277 : f32 to vector<16x16xf32>
    %279 = arith.addf %276, %278 : vector<16x16xf32>
    %c16 = arith.constant 16 : index
    %280 = memref.load %arg26[%c16] : memref<26xf32, #tpu.memory_space<smem>>
    %281 = vector.broadcast %280 : f32 to vector<16x16xf32>
    %282 = arith.mulf %279, %281 : vector<16x16xf32>
    %c17 = arith.constant 17 : index
    %283 = memref.load %arg26[%c17] : memref<26xf32, #tpu.memory_space<smem>>
    %284 = vector.broadcast %283 : f32 to vector<16x16xf32>
    %285 = arith.addf %282, %284 : vector<16x16xf32>
    %cst_146 = arith.constant 0.000000e+00 : f32
    %286 = vector.broadcast %cst_146 : f32 to vector<16x16xf32>
    %287 = arith.maximumf %285, %286 : vector<16x16xf32>
    %c0_147 = arith.constant 0 : index
    %c0_148 = arith.constant 0 : index
    %288 = vector.load %arg20[%c0_147, %c0_148] : memref<16x16xbf16, #tpu.memory_space<vmem>>, vector<16x16xbf16>
    %289 = arith.truncf %287 : vector<16x16xf32> to vector<16x16xbf16>
    %cst_149 = arith.constant dense<0.000000e+00> : vector<16x16xf32>
    %290 = tpu.matmul %288, %289, %cst_149 {dimension_numbers = #tpu.dot_dimension_numbers<[1], [0], [0], [1], [0, 0, 1, 1], [], []>} : vector<16x16xbf16>, vector<16x16xbf16>, vector<16x16xf32> -> vector<16x16xf32>
    %c18 = arith.constant 18 : index
    %291 = memref.load %arg26[%c18] : memref<26xf32, #tpu.memory_space<smem>>
    %292 = vector.broadcast %291 : f32 to vector<16x16xf32>
    %293 = arith.addf %290, %292 : vector<16x16xf32>
    %c0_150 = arith.constant 0 : index
    %c0_151 = arith.constant 0 : index
    %294 = vector.load %arg21[%c0_150, %c0_151] : memref<16x16xbf16, #tpu.memory_space<vmem>>, vector<16x16xbf16>
    %295 = arith.truncf %253 : vector<16x16xf32> to vector<16x16xbf16>
    %cst_152 = arith.constant dense<0.000000e+00> : vector<16x16xf32>
    %296 = tpu.matmul %295, %294, %cst_152 {dimension_numbers = #tpu.dot_dimension_numbers<[1], [0], [0], [1], [0, 0, 1, 1], [], []>} : vector<16x16xbf16>, vector<16x16xbf16>, vector<16x16xf32> -> vector<16x16xf32>
    %c19 = arith.constant 19 : index
    %297 = memref.load %arg26[%c19] : memref<26xf32, #tpu.memory_space<smem>>
    %298 = vector.broadcast %297 : f32 to vector<16x16xf32>
    %299 = arith.addf %296, %298 : vector<16x16xf32>
    %c20 = arith.constant 20 : index
    %300 = memref.load %arg26[%c20] : memref<26xf32, #tpu.memory_space<smem>>
    %301 = vector.broadcast %300 : f32 to vector<16x16xf32>
    %302 = arith.mulf %299, %301 : vector<16x16xf32>
    %c21 = arith.constant 21 : index
    %303 = memref.load %arg26[%c21] : memref<26xf32, #tpu.memory_space<smem>>
    %304 = vector.broadcast %303 : f32 to vector<16x16xf32>
    %305 = arith.addf %302, %304 : vector<16x16xf32>
    %cst_153 = arith.constant 0.000000e+00 : f32
    %306 = vector.broadcast %cst_153 : f32 to vector<16x16xf32>
    %307 = arith.maximumf %305, %306 : vector<16x16xf32>
    %c0_154 = arith.constant 0 : index
    %c0_155 = arith.constant 0 : index
    %308 = vector.load %arg22[%c0_154, %c0_155] : memref<16x16xbf16, #tpu.memory_space<vmem>>, vector<16x16xbf16>
    %309 = arith.truncf %307 : vector<16x16xf32> to vector<16x16xbf16>
    %cst_156 = arith.constant dense<0.000000e+00> : vector<16x16xf32>
    %310 = tpu.matmul %308, %309, %cst_156 {dimension_numbers = #tpu.dot_dimension_numbers<[1], [0], [0], [1], [0, 0, 1, 1], [], []>} : vector<16x16xbf16>, vector<16x16xbf16>, vector<16x16xf32> -> vector<16x16xf32>
    %c22 = arith.constant 22 : index
    %311 = memref.load %arg26[%c22] : memref<26xf32, #tpu.memory_space<smem>>
    %312 = vector.broadcast %311 : f32 to vector<16x16xf32>
    %313 = arith.addf %310, %312 : vector<16x16xf32>
    %c23 = arith.constant 23 : index
    %314 = memref.load %arg26[%c23] : memref<26xf32, #tpu.memory_space<smem>>
    %315 = vector.broadcast %314 : f32 to vector<16x16xf32>
    %316 = arith.mulf %273, %315 : vector<16x16xf32>
    %c24 = arith.constant 24 : index
    %317 = memref.load %arg26[%c24] : memref<26xf32, #tpu.memory_space<smem>>
    %318 = vector.broadcast %317 : f32 to vector<16x16xf32>
    %319 = arith.mulf %293, %318 : vector<16x16xf32>
    %320 = arith.addf %316, %319 : vector<16x16xf32>
    %c25 = arith.constant 25 : index
    %321 = memref.load %arg26[%c25] : memref<26xf32, #tpu.memory_space<smem>>
    %322 = vector.broadcast %321 : f32 to vector<16x16xf32>
    %323 = arith.mulf %313, %322 : vector<16x16xf32>
    %324 = arith.addf %320, %323 : vector<16x16xf32>
    %325 = arith.negf %324 : vector<16x16xf32>
    %326 = math.exp %325 : vector<16x16xf32>
    %cst_157 = arith.constant 1.000000e+00 : f32
    %327 = vector.broadcast %cst_157 : f32 to vector<16x16xf32>
    %328 = arith.addf %327, %326 : vector<16x16xf32>
    %329 = arith.divf %327, %328 : vector<16x16xf32>
    %330 = arith.mulf %210, %329 : vector<16x16xf32>
    %c0_158 = arith.constant 0 : index
    %c0_159 = arith.constant 0 : index
    %c0_160 = arith.constant 0 : index
    %331 = vector.load %arg30[%c0_158, %c0_159, %c0_160] : memref<1x16x16xf32, #tpu.memory_space<vmem>>, vector<1x16x16xf32>
    %332 = vector.shape_cast %331 : vector<1x16x16xf32> to vector<16x16xf32>
    %333 = vector.shape_cast %330 : vector<16x16xf32> to vector<1x16x16xf32>
    tpu.vector_store %arg30[%c0_158, %c0_159, %c0_160], %333 {strides = array<i32>} : memref<1x16x16xf32, #tpu.memory_space<vmem>>, vector<1x16x16xf32>,
    %c0_161 = arith.constant 0 : index
    %c0_162 = arith.constant 0 : index
    %334 = vector.load %arg24[%c0_161, %c0_162] : memref<16x256xbf16, #tpu.memory_space<vmem>>, vector<16x256xbf16>
    %335 = arith.truncf %329 : vector<16x16xf32> to vector<16x16xbf16>
    %cst_163 = arith.constant dense<0.000000e+00> : vector<16x256xf32>
    %336 = tpu.matmul %335, %334, %cst_163 {dimension_numbers = #tpu.dot_dimension_numbers<[1], [0], [0], [1], [0, 0, 1, 1], [], []>} : vector<16x16xbf16>, vector<16x256xbf16>, vector<16x256xf32> -> vector<16x256xf32>
    %337 = arith.mulf %336, %156 : vector<16x256xf32>
    %cst_164 = arith.constant dense<0.000000e+00> : vector<256xf32>
    %338 = vector.multi_reduction <add>, %337, %cst_164 [0] : vector<16x256xf32> to vector<256xf32>
    %339 = vector.shape_cast %338 : vector<256xf32> to vector<1x256xf32>
    %340 = vector.broadcast %339 : vector<1x256xf32> to vector<8x256xf32>
    %341 = arith.mulf %97, %340 : vector<8x256xf32>
    %342 = arith.addf %1, %341 : vector<8x256xf32>
    %c0_165 = arith.constant 0 : index
    %c0_166 = arith.constant 0 : index
    %c0_167 = arith.constant 0 : index
    %343 = vector.load %arg27[%c0_165, %c0_166, %c0_167] : memref<1x8x256xf32, #tpu.memory_space<vmem>>, vector<1x8x256xf32>
    %344 = vector.shape_cast %343 : vector<1x8x256xf32> to vector<8x256xf32>
    %345 = vector.shape_cast %342 : vector<8x256xf32> to vector<1x8x256xf32>
    tpu.vector_store %arg27[%c0_165, %c0_166, %c0_167], %345 {strides = array<i32>} : memref<1x8x256xf32, #tpu.memory_space<vmem>>, vector<1x8x256xf32>,
    %346 = vector.broadcast %339 : vector<1x256xf32> to vector<8x256xf32>
    %347 = arith.mulf %3, %346 : vector<8x256xf32>
    %348 = arith.addf %3, %347 : vector<8x256xf32>
    %c0_168 = arith.constant 0 : index
    %c0_169 = arith.constant 0 : index
    %c0_170 = arith.constant 0 : index
    %349 = vector.load %arg28[%c0_168, %c0_169, %c0_170] : memref<1x8x256xf32, #tpu.memory_space<vmem>>, vector<1x8x256xf32>
    %350 = vector.shape_cast %349 : vector<1x8x256xf32> to vector<8x256xf32>
    %351 = vector.shape_cast %348 : vector<8x256xf32> to vector<1x8x256xf32>
    tpu.vector_store %arg28[%c0_168, %c0_169, %c0_170], %351 {strides = array<i32>} : memref<1x8x256xf32, #tpu.memory_space<vmem>>, vector<1x8x256xf32>,
    return
  }
  func.func @transform_0(%arg0: i32) -> (i32, i32, i32) {
    %c0_i32 = arith.constant 0 : i32
    %c0_i32_0 = arith.constant 0 : i32
    %c0_i32_1 = arith.constant 0 : i32
    return %arg0, %c0_i32, %c0_i32_0 : i32, i32, i32
  }
  func.func @transform_1(%arg0: i32) -> (i32, i32, i32) {
    %c0_i32 = arith.constant 0 : i32
    %c0_i32_0 = arith.constant 0 : i32
    %c0_i32_1 = arith.constant 0 : i32
    return %arg0, %c0_i32, %c0_i32_0 : i32, i32, i32
  }
  func.func @transform_2(%arg0: i32) -> (i32, i32, i32) {
    %c0_i32 = arith.constant 0 : i32
    %c0_i32_0 = arith.constant 0 : i32
    %c0_i32_1 = arith.constant 0 : i32
    return %arg0, %c0_i32, %c0_i32_0 : i32, i32, i32
  }
  func.func @transform_3(%arg0: i32) -> (i32, i32, i32) {
    %c0_i32 = arith.constant 0 : i32
    %c0_i32_0 = arith.constant 0 : i32
    %c0_i32_1 = arith.constant 0 : i32
    return %arg0, %c0_i32, %c0_i32_0 : i32, i32, i32
  }
  func.func @transform_4(%arg0: i32) -> (i32, i32) {
    %c0_i32 = arith.constant 0 : i32
    %c0_i32_0 = arith.constant 0 : i32
    %c0_i32_1 = arith.constant 0 : i32
    return %c0_i32, %c0_i32_0 : i32, i32
  }
  func.func @transform_5(%arg0: i32) -> (i32, i32) {
    %c0_i32 = arith.constant 0 : i32
    %c0_i32_0 = arith.constant 0 : i32
    %c0_i32_1 = arith.constant 0 : i32
    return %c0_i32, %c0_i32_0 : i32, i32
  }
  func.func @transform_6(%arg0: i32) -> (i32, i32) {
    %c0_i32 = arith.constant 0 : i32
    %c0_i32_0 = arith.constant 0 : i32
    %c0_i32_1 = arith.constant 0 : i32
    return %c0_i32, %c0_i32_0 : i32, i32
  }
  func.func @transform_7(%arg0: i32) -> (i32, i32) {
    %c0_i32 = arith.constant 0 : i32
    %c0_i32_0 = arith.constant 0 : i32
    %c0_i32_1 = arith.constant 0 : i32
    return %c0_i32, %c0_i32_0 : i32, i32
  }
  func.func @transform_8(%arg0: i32) -> (i32, i32) {
    %c0_i32 = arith.constant 0 : i32
    %c0_i32_0 = arith.constant 0 : i32
    %c0_i32_1 = arith.constant 0 : i32
    return %c0_i32, %c0_i32_0 : i32, i32
  }
  func.func @transform_9(%arg0: i32) -> (i32, i32) {
    %c0_i32 = arith.constant 0 : i32
    %c0_i32_0 = arith.constant 0 : i32
    %c0_i32_1 = arith.constant 0 : i32
    return %c0_i32, %c0_i32_0 : i32, i32
  }
  func.func @transform_10(%arg0: i32) -> (i32, i32) {
    %c0_i32 = arith.constant 0 : i32
    %c0_i32_0 = arith.constant 0 : i32
    %c0_i32_1 = arith.constant 0 : i32
    return %c0_i32, %c0_i32_0 : i32, i32
  }
  func.func @transform_11(%arg0: i32) -> (i32, i32) {
    %c0_i32 = arith.constant 0 : i32
    %c0_i32_0 = arith.constant 0 : i32
    %c0_i32_1 = arith.constant 0 : i32
    return %c0_i32, %c0_i32_0 : i32, i32
  }
  func.func @transform_12(%arg0: i32) -> (i32, i32, i32) {
    %c0_i32 = arith.constant 0 : i32
    %c0_i32_0 = arith.constant 0 : i32
    %c0_i32_1 = arith.constant 0 : i32
    %c0_i32_2 = arith.constant 0 : i32
    return %c0_i32, %c0_i32_0, %c0_i32_1 : i32, i32, i32
  }
  func.func @transform_13(%arg0: i32) -> (i32, i32, i32) {
    %c0_i32 = arith.constant 0 : i32
    %c0_i32_0 = arith.constant 0 : i32
    %c0_i32_1 = arith.constant 0 : i32
    %c0_i32_2 = arith.constant 0 : i32
    return %c0_i32, %c0_i32_0, %c0_i32_1 : i32, i32, i32
  }
  func.func @transform_14(%arg0: i32) -> (i32, i32, i32) {
    %c0_i32 = arith.constant 0 : i32
    %c0_i32_0 = arith.constant 0 : i32
    %c0_i32_1 = arith.constant 0 : i32
    %c0_i32_2 = arith.constant 0 : i32
    return %c0_i32, %c0_i32_0, %c0_i32_1 : i32, i32, i32
  }
  func.func @transform_15(%arg0: i32) -> (i32, i32) {
    %c0_i32 = arith.constant 0 : i32
    %c0_i32_0 = arith.constant 0 : i32
    %c0_i32_1 = arith.constant 0 : i32
    return %c0_i32, %c0_i32_0 : i32, i32
  }
  func.func @transform_16(%arg0: i32) -> (i32, i32, i32) {
    %c0_i32 = arith.constant 0 : i32
    %c0_i32_0 = arith.constant 0 : i32
    %c0_i32_1 = arith.constant 0 : i32
    %c0_i32_2 = arith.constant 0 : i32
    return %c0_i32, %c0_i32_0, %c0_i32_1 : i32, i32, i32
  }
  func.func @transform_17(%arg0: i32) -> (i32, i32, i32) {
    %c0_i32 = arith.constant 0 : i32
    %c0_i32_0 = arith.constant 0 : i32
    %c0_i32_1 = arith.constant 0 : i32
    %c0_i32_2 = arith.constant 0 : i32
    return %c0_i32, %c0_i32_0, %c0_i32_1 : i32, i32, i32
  }
  func.func @transform_18(%arg0: i32) -> (i32, i32) {
    %c0_i32 = arith.constant 0 : i32
    %c0_i32_0 = arith.constant 0 : i32
    %c0_i32_1 = arith.constant 0 : i32
    return %c0_i32, %c0_i32_0 : i32, i32
  }
  func.func @transform_19(%arg0: i32) -> (i32, i32) {
    %c0_i32 = arith.constant 0 : i32
    %c0_i32_0 = arith.constant 0 : i32
    %c0_i32_1 = arith.constant 0 : i32
    return %c0_i32, %c0_i32_0 : i32, i32
  }
  func.func @transform_20(%arg0: i32) -> (i32, i32) {
    %c0_i32 = arith.constant 0 : i32
    %c0_i32_0 = arith.constant 0 : i32
    %c0_i32_1 = arith.constant 0 : i32
    return %c0_i32, %c0_i32_0 : i32, i32
  }
  func.func @transform_21(%arg0: i32) -> (i32, i32) {
    %c0_i32 = arith.constant 0 : i32
    %c0_i32_0 = arith.constant 0 : i32
    %c0_i32_1 = arith.constant 0 : i32
    return %c0_i32, %c0_i32_0 : i32, i32
  }
  func.func @transform_22(%arg0: i32) -> (i32, i32) {
    %c0_i32 = arith.constant 0 : i32
    %c0_i32_0 = arith.constant 0 : i32
    %c0_i32_1 = arith.constant 0 : i32
    return %c0_i32, %c0_i32_0 : i32, i32
  }
  func.func @transform_23(%arg0: i32) -> (i32, i32) {
    %c0_i32 = arith.constant 0 : i32
    %c0_i32_0 = arith.constant 0 : i32
    %c0_i32_1 = arith.constant 0 : i32
    return %c0_i32, %c0_i32_0 : i32, i32
  }
  func.func @transform_24(%arg0: i32) -> (i32, i32) {
    %c0_i32 = arith.constant 0 : i32
    %c0_i32_0 = arith.constant 0 : i32
    %c0_i32_1 = arith.constant 0 : i32
    return %c0_i32, %c0_i32_0 : i32, i32
  }
  func.func @transform_25(%arg0: i32) -> i32 {
    %c0_i32 = arith.constant 0 : i32
    %c0_i32_0 = arith.constant 0 : i32
    return %c0_i32 : i32
  }
  func.func @transform_26(%arg0: i32) -> (i32, i32, i32) {
    %c0_i32 = arith.constant 0 : i32
    %c0_i32_0 = arith.constant 0 : i32
    %c0_i32_1 = arith.constant 0 : i32
    return %arg0, %c0_i32, %c0_i32_0 : i32, i32, i32
  }
  func.func @transform_27(%arg0: i32) -> (i32, i32, i32) {
    %c0_i32 = arith.constant 0 : i32
    %c0_i32_0 = arith.constant 0 : i32
    %c0_i32_1 = arith.constant 0 : i32
    return %arg0, %c0_i32, %c0_i32_0 : i32, i32, i32
  }
  func.func @transform_28(%arg0: i32) -> (i32, i32, i32) {
    %c0_i32 = arith.constant 0 : i32
    %c0_i32_0 = arith.constant 0 : i32
    %c0_i32_1 = arith.constant 0 : i32
    return %arg0, %c0_i32, %c0_i32_0 : i32, i32, i32
  }
  func.func @transform_29(%arg0: i32) -> (i32, i32, i32) {
    %c0_i32 = arith.constant 0 : i32
    %c0_i32_0 = arith.constant 0 : i32
    %c0_i32_1 = arith.constant 0 : i32
    return %arg0, %c0_i32, %c0_i32_0 : i32, i32, i32
  }
}

</mosaic_0001>

<bundles_post_ra>
// kernel: dcmsa_pallas.1
= control target key start
LH: loop header
LB: loop body
LE: loop exit
PB: predicated region body
PF: predicated region fallthrough
CT: control target
= control target key end

     0   :  { %s3050_s6 = smov 1   ;;  %s3051_s10 = smov 2   ;;  %s3562_s0 = inlined_call_operand.smem [shape: u32[30], index: -1, kind: input, shape index: {}] }
   0x1   :  { %s3093_s5 = sld [smem:[%s3562_s0]]   ;;  %s3052_s14 = smov 3  }
   0x2   :  { %s3098_s9 = sld [smem:[%s3562_s0 + %s3050_s6]]   ;;  %s3053_s18 = smov 4  }
   0x3   :  { %s3103_s13 = sld [smem:[%s3562_s0 + %s3051_s10]]   ;;  %s3054_s22 = smov 5  }
   0x4   :  { %s3108_s17 = sld [smem:[%s3562_s0 + %s3052_s14]]   ;;  %s3055_s26 = smov 6  }
   0x5   :  { %s3113_s21 = sld [smem:[%s3562_s0 + %s3053_s18]]   ;;  %s3056_s30 = smov 7  }
   0x6   :  { %s3118_s25 = sld [smem:[%s3562_s0 + %s3054_s22]]   ;;  %s3057_s4 = smov 8  }
   0x7   :  { %3577 = sst [smem:[#allocation8_spill]] %s3093_s5  ;;  %s3058_s10 = smov 9  }
   0x8   :  { %3578 = sst [smem:[#allocation9_spill]] %s3098_s9  ;;  %s3059_s15 = smov 10  }
   0x9   :  { %3579 = sst [smem:[#allocation10_spill]] %s3103_s13  ;;  %s3060_s20 = smov 11  }
   0xa   :  { %3580 = sst [smem:[#allocation11_spill]] %s3108_s17  ;;  %s3062_s1 = smov 13  }
   0xb   :  { %s3123_s29 = sld [smem:[%s3562_s0 + %s3055_s26]]   ;;  %s3061_s26 = smov 12  }
   0xc   :  { %s3128_s3 = sld [smem:[%s3562_s0 + %s3056_s30]]   ;;  %s3063_s7 = smov 14  }
   0xd   :  { %s3133_s8 = sld [smem:[%s3562_s0 + %s3057_s4]]   ;;  %s3065_s22 = smov 16  }
   0xe   :  { %s3138_s14 = sld [smem:[%s3562_s0 + %s3058_s10]]   ;;  %s3066_s28 = smov 17  }
   0xf   :  { %s3143_s19 = sld [smem:[%s3562_s0 + %s3059_s15]]   ;;  %s3064_s15 = smov 15  }
  0x10   :  { %s3148_s24 = sld [smem:[%s3562_s0 + %s3060_s20]]  }
  0x11   :  { %s3153_s30 = sld [smem:[%s3562_s0 + %s3061_s26]]  }
  0x12   :  { %3581 = sst [smem:[#allocation12_spill]] %s3128_s3 }
  0x13   :  { %3582 = sst [smem:[#allocation13_spill]] %s3133_s8 }
  0x14   :  { %3583 = sst [smem:[#allocation14_spill]] %s3138_s14 }
  0x15   :  { %s3158_s6 = sld [smem:[%s3562_s0 + %s3062_s1]]  }
  0x16   :  { %s3163_s12 = sld [smem:[%s3562_s0 + %s3063_s7]]   ;;  %s3067_s7 = smov 18  }
  0x17   :  { %s3168_s20 = sld [smem:[%s3562_s0 + %s3064_s15]]   ;;  %s3068_s15 = smov 19  }
  0x18   :  { %s3173_s27 = sld [smem:[%s3562_s0 + %s3065_s22]]   ;;  %s3069_s22 = smov 20  }
  0x19   :  { %s3178_s4 = sld [smem:[%s3562_s0 + %s3066_s28]]   ;;  %s3070_s28 = smov 21  }
  0x1b   :  { %3584 = sst [smem:[#allocation15_spill]] %s3158_s6 }
  0x1c   :  { %3585 = sst [smem:[#allocation16_spill]] %s3163_s12 }
  0x1d   :  { %3586 = sst [smem:[#allocation17_spill]] %s3168_s20 }
  0x1e   :  { %3587 = sst [smem:[#allocation18_spill]] %s3173_s27 }
  0x1f   :  { %3588 = sst [smem:[#allocation19_spill]] %s3178_s4 }
  0x20   :  { %s3183_s12 = sld [smem:[%s3562_s0 + %s3067_s7]]   ;;  %s3071_s7 = smov 22  }
  0x21   :  { %s3188_s20 = sld [smem:[%s3562_s0 + %s3068_s15]]   ;;  %s3072_s15 = smov 23  }
  0x22   :  { %s3193_s27 = sld [smem:[%s3562_s0 + %s3069_s22]]   ;;  %s3073_s22 = smov 24  }
  0x23   :  { %s3198_s4 = sld [smem:[%s3562_s0 + %s3070_s28]]   ;;  %s3074_s28 = smov 25  }
  0x26   :  { %3589 = sst [smem:[#allocation20_spill]] %s3183_s12 }
  0x27   :  { %3590 = sst [smem:[#allocation21_spill]] %s3188_s20 }
  0x28   :  { %3591 = sst [smem:[#allocation22_spill]] %s3193_s27 }
  0x29   :  { %3592 = sst [smem:[#allocation23_spill]] %s3198_s4 }
  0x2a   :  { %s3203_s12 = sld [smem:[%s3562_s0 + %s3071_s7]]   ;;  %s3075_s7 = smov 26  }
  0x2b   :  { %s3208_s20 = sld [smem:[%s3562_s0 + %s3072_s15]]   ;;  %s3076_s15 = smov 27  }
  0x2c   :  { %s3213_s27 = sld [smem:[%s3562_s0 + %s3073_s22]]   ;;  %s3077_s22 = smov 28  }
  0x2d   :  { %s3218_s4 = sld [smem:[%s3562_s0 + %s3074_s28]]   ;;  %s3078_s28 = smov 29  }
  0x2e   :  { %s3223_s9 = sld [smem:[%s3562_s0 + %s3075_s7]]  }
  0x30   :  { %3593 = sst [smem:[#allocation24_spill]] %s3203_s12 }
  0x31   :  { %3594 = sst [smem:[#allocation25_spill]] %s3208_s20 }
  0x32   :  { %3595 = sst [smem:[#allocation26_spill]] %s3213_s27 }
  0x33   :  { %3596 = sst [smem:[#allocation27_spill]] %s3218_s4 }
  0x34   :  { %s3228_s20 = sld [smem:[%s3562_s0 + %s3076_s15]]  }
  0x35   :  { %s3233_s27 = sld [smem:[%s3562_s0 + %s3077_s22]]  }
  0x36   :  { %s3238_s12 = sld [smem:[%s3562_s0 + %s3078_s28]]  }
  0x37   :  { %65 = vsyncpa [#allocation4], 0 }
  0x38   :  { %66 = vsyncpa [#allocation3], 0 }
  0x39   :  { %68 = vsyncpa [#allocation3 + $0x1], 0  ;;  %s3240_s7 = smov 0   ;;  %s3242_s10 = smov 0  }
  0x3a   :  { %s3244_s11 = smov 0   ;;  %s3246_s15 = smov 0  }
  0x3b LB: > { %s3597_s6 = sld [smem:[#allocation15_spill]]  ;;  %s3261_s0 = sadd.s32 4294967295, %s3048_s15   ;;  %s3040_s10 = sphi %s3242_s10, %s3628_s10   ;;  %s3036_s7 = sphi %s3240_s7, %s3627_s7   ;;  %s3048_s15 = sphi %s3246_s15, %s3624_s15   ;;  %s3044_s11 = sphi %s3244_s11, %s3626_s11  }
  0x3c   : > { %s3598_s4 = sld [smem:[#allocation27_spill]]  ;;  %s2525_s16 = sadd.s32 4294967294, %s3048_s15  }
  0x3d   : > { %3599 = sst [smem:[#allocation28_spill]] %s3044_s11  ;;  %s3265_s18 = sadd.s32 1, %s3048_s15  }
  0x3e   : > { %3600 = sst [smem:[#allocation29_spill]] %s3265_s18  ;;  %s725_s22 = sadd.s32 1, %s3044_s11 }
  0x3f   : > { %s722_s23 = ssub.s32 %s3048_s15, %s3265_s18  ;;  %p735_p0 = scmp.ne.s32.totalorder %s3044_s11, %s3040_s10 }
  0x40   : > { %p723_p1 = scmp.eq.s32.totalorder %s722_s23, 0  ;;  %p736_p2 = scmp.eq.s32.totalorder %s3261_s0, 1 }
  0x41   : > { %p741_p3 = scmp.ne.s32.totalorder %s3040_s10, %s3036_s7  ;;  %p742_p4 = scmp.eq.s32.totalorder %s2525_s16, 1 }
  0x42   : > { %s3276_s26 = scalar_select %p723_p1, %s3044_s11, %s725_s22  }
  0x43   : > { %p3278_p5 = por %p736_p2, %p735_p0  ;;  %p3282_p6 = por %p742_p4, %p741_p3 }
  0x44   : > { %3601 = sst [smem:[#allocation30_spill]] %s3276_s26  ;;  %p2526_p7 = scmp.ge.s32.totalorder %s3048_s15, 1 }
  0x45   : > { %p749_p8 = scmp.lt.s32.totalorder %s3048_s15, 3  ;;  %p2866_p9 = scmp.eq.s32.totalorder %s3261_s0, 0 }
  0x46   : > { %s824_s16 = sshll.u32 %s3598_s4, 4  ;;  %s2974_s11 = scalar_lea.vmem %s3598_s4, 1  ;;  %s825_s16 = int_to_ptr.vmem [resolvable:$true] %s824_s16 }
  0x47   : > { %p3289_p10 = pnand %p2526_p7, %p749_p8  ;;  %s2967_s23 = sshra.s32 %s825_s16, 4  ;;  %s2968_s23 = int_to_ptr.vmem [resolvable:$true] %s2967_s23 }
  0x48   : > { %s2969_s26 = scalar_lea.vmem %s2968_s23, 1  ;;  %p2975_p3 = scmp.lt.s32.totalorder %s2968_s23, %s3598_s4 }
  0x49   : > { %p2858_p11 = pneg %p3289_p10  ;;  %p2970_p13 = scmp.ne.s32.totalorder %s2968_s23, %s2969_s26 }
  0x4a   : > { %p2976_p4 = scmp.lt.s32.totalorder %s2974_s11, %s2969_s26 }
  0x4b   : > { %p3298_p12 = pnand %p2866_p9, %p2858_p11 }
  0x4c   : > { %p2977_p7 = por %p2976_p4, %p2975_p3 }
  0x4d   : > { %p2971_p0 = pneg %p3298_p12 }
  0x4f   : > { %p2972_p1 = pnand %p2971_p0, %p2970_p13 }
  0x51   : > { %p2973_p2 = pneg %p2972_p1 }
  0x53   : > { %p2978_p8 = pnand %p2977_p7, %p2973_p2 }
  0x55   : > { %2981 = shalt.err (!%p2978_p8)
}
  0x56   : > { %s3079_s18 = smov [#allocation2]   ;;  %867 = sbr.rel (%p3289_p10) target bundleno = 1880 (0x758), region = 124 }
  0x57   : > { %2861 = dma.vmem_to_smem (!%p3298_p12), %s825_s16, 16, %s3079_s18, [#allocation4]  }
  0x5b   : > { %3027 = dma.done.wait (%p2866_p9), [#allocation4], 16  }
  0x5c   : > { %3029 = vsyncadd (%p2866_p9), [#allocation4], 4294967280 }
  0x5d   : > { %874 = sfence }
  0x5e   : > { %s3606_s13 = sld [smem:[#allocation10_spill]]  ;;  %p972_p11 = scmp.lt.s32.totalorder %s3261_s0, 1  ;;  %v1009_v0 = vld [vmem:[%s3113_s21] sm:$0xff]  ;;  %vm1015_vm0 = vcmask 130048   ;;  %v3080_v7 = vmov 8.0   ;;  %vm1021_vm1 = vcmask 7168  }
  0x5f   : > { %s3607_s5 = sld [smem:[#allocation8_spill]]  ;;  %2939 = vrcp.f32 %v3080_v7  ;;  %v1019_v10 = vld [vmem:[%s3118_s25] sm:$0xff]  ;;  %v3081_v39 = vmov 0   ;;  %vm1178_vm6 = vcmask 261120   ;;  %vm1120_vm10 = vcmask 64512  }
  0x60   : > { %s3316_s11 = scalar_select %p972_p11, %s3261_s0, 1  ;;  %2936 = vset.pattern.permute.xlu1 %v3081_v39  ;;  %2937 = vset.pattern.permute.xlu0 %v3081_v39  ;;  %v1059_v43 = vld [vmem:[%s3123_s29] sm:$0xff] }
  0x61   : > { %s3608_s3 = sld [smem:[#allocation12_spill]] }
  0x62   : > { %s3322_s26 = sshll.u32 %s3316_s11, 4  ;;  %s1068_s16 = sld [smem:[#allocation2]] }
  0x63   : > { %s2543_s22 = sld [smem:[#allocation2 + $0x1]] }
  0x64   : > { %s984_s18 = scalar_lea.vmem %s3606_s13, %s3316_s11  ;;  %s2544_s23 = sld [smem:[#allocation2 + $0x2]] }
  0x65   : > { %v2938_v1 = vld [vmem:[%s984_s18] ss:$0 sm:$0xff]  ;;  %s3326_s2 = scalar_lea.vmem %s3607_s5, %s3322_s26  ;;  %v2940_v8 = vpop.eup %2939  ;;  %s3609_s17 = sld [smem:[#allocation11_spill]] }
  0x66   : > { %v1014_v2 = vmul.f32 %v2938_v1, %v1009_v0  ;;  %v3330_v4 = vld [vmem:[%s3326_s2] sm:$0xff]  ;;  %v3333_v5 = vld [vmem:[%s3326_s2 + $0x8] sm:$0xff]  ;;  %v1030_v9 = vmul.f32 8.0, %v2940_v8  ;;  %vm1034_vm2 = vweird.f32 %v2940_v8  ;;  %s2805_s18 = sshll.u32 %s3316_s11, 5  ;;  %s3610_s8 = sld [smem:[#allocation13_spill]] }
  0x67   : > { %v1064_v6 = vadd.f32 %v3333_v5, %v3330_v4  ;;  %v1061_v47 = vld [vmem:[%s3608_s3] sm:$0xff]  ;;  %s3611_s14 = sld [smem:[#allocation14_spill]] }
  0x68   : > { %v1016_v3 = vsel %vm1015_vm0, %v1014_v2, 0.0  ;;  %v1031_v12 = vsub.f32 1.0, %v1030_v9  ;;  %v1069_v50 = vstv %s1068_s16  ;;  %s2682_s3 = sld [smem:[#allocation2 + $0x6]] }
  0x69   : > { %1017 = vadd.xlane.f32.xlu0 %v1016_v3  ;;  %v1072_v52 = vstv %s2543_s22  ;;  %s3612_s22 = sld [smem:[#allocation24_spill]] }
  0x6a   : > { %v1032_v16 = vmul.f32 %v2940_v8, %v1031_v12  ;;  %v1076_v56 = vstv %s2544_s23  ;;  %s3613_s23 = sld [smem:[#allocation9_spill]] }
  0x6b   : > { %s989_s16 = scalar_lea.vmem %s3609_s17, %s2805_s18  ;;  %s3617_s4 = sld [smem:[#allocation17_spill]] }
  0x6c   : > { %v1033_v19 = vadd.f32 %v2940_v8, %v1032_v16  ;;  %v1165_v16 = vld [vmem:[%s989_s16] sm:$0xff]  ;;  %s2683_s5 = sld [smem:[#allocation2 + $0x7]]  ;;  %s3002_s17 = scalar_lea.hbm %s3238_s12, 32 }
  0x6d   : > { %s3621_s13 = sld [smem:[#allocation23_spill]] }
  0x6e   : > { %v3339_v22 = vsel %vm1034_vm2, %v2940_v8, %v1033_v19 }
  0x70   : > { %s981_s18 = scalar_lea.vmem %s3613_s23, %s3322_s26 }
  0x71   : > { %1065 = vadd.xlane.f32.xlu0 %v1064_v6 }
  0xdc   : > { %v1018_v11 = vpop.xlane.xlu0 %1017 }
  0xdd   : > { %v1020_v13 = vadd.f32 %v1019_v10, %v1018_v11 }
  0xdf   : > { %v1022_v14 = vsel %vm1021_vm1, %v1020_v13, 0.0 }
  0xe0   : > { %v1023_v15 = vrot.slane %v1022_v14, 4 }
  0xe2   : > { %v1024_v17 = vadd.f32 %v1023_v15, %v1022_v14  ;;  %v1167_v14 = vld [vmem:[%s989_s16 + $0x10] sm:$0xff]  ;;  %v1168_v15 = vld [vmem:[%s989_s16 + $0x18] sm:$0xff] }
  0xe4   : > { %v1025_v18 = vrot.slane %v1024_v17, 2  ;;  %v1066_v45 = vpop.xlane.xlu0 %1065 }
  0xe5   : > { %v3346_v49 = vmul.f32 0.00390625, %v1066_v45 }
  0xe6   : > { %v1026_v20 = vadd.f32 %v1025_v18, %v1024_v17  ;;  %v1172_v17 = vpack.c.bf16 %v1168_v15, %v1167_v14  ;;  %v1166_v18 = vld [vmem:[%s989_s16 + $0x8] sm:$0xff]  ;;  %v2829_v14 = vld [vmem:[%s3612_s22 + $0x60] sm:$0xff]  ;;  %s2542_s16 = sshll.u32 %s3316_s11, 3  ;;  %s3418_s11 = sld [smem:[#allocation2 + $0x4]] }
  0xe7   : > { %v1070_v54 = vmul.f32 %v1069_v50, %v3346_v49  ;;  %s1003_s23 = scalar_lea.vmem %s3233_s27, %s2542_s16  ;;  %s3614_s16 = sld [smem:[#allocation26_spill]] }
  0xe8   : > { %v1027_v21 = vrot.slane %v1026_v20, 1  ;;  %1188 = vmatpush.bf16.msra.mxu0 %v1172_v17  ;;  %1218 = vmatpush.bf16.msra.mxu1 %v1172_v17 }
  0xea   : > { %v1028_v23 = vadd.f32 %v1027_v21, %v1026_v20  ;;  %v1171_v20 = vpack.c.bf16 %v1166_v18, %v1165_v16 }
  0xec   : > { %v1036_v24 = vmul.f32 %v3339_v22, %v1028_v23  ;;  %v2808_v23 = vld [vmem:[%s3153_s30] sm:$0xff]  ;;  %1189 = vmatpush.bf16.msra.mxu0 %v1171_v20  ;;  %1219 = vmatpush.bf16.msra.mxu1 %v1171_v20 }
  0xee   : > { %v1037_v25 = vsub.f32 %v1020_v13, %v1036_v24  ;;  %v2811_v24 = vld [vmem:[%s3153_s30 + $0x8] sm:$0xff] }
  0xef   : > { %2551 = vmatmul.msk.bf16.vlgmr.msra.gmra.mxu0 %vm1178_vm6, %v2808_v23  ;;  %2558 = vmatmul.msk.bf16.vlgmr.msra.gmra.mxu1 %vm1178_vm6, %v2811_v24 }
  0xf0   : > { %v1038_v26 = vmul.f32 %v1037_v25, %v1037_v25  ;;  %1307 = vmatpush.bf16.msrb.mxu0 %v1172_v17 }
  0xf2   : > { %v1039_v27 = vsel %vm1021_vm1, %v1038_v26, 0.0 }
  0xf3   : > { %v1040_v28 = vrot.slane %v1039_v27, 4 }
  0xf4   : > { %1308 = vmatpush.bf16.msrb.mxu0 %v1171_v20 }
  0xf5   : > { %v1041_v29 = vadd.f32 %v1040_v28, %v1039_v27 }
  0xf7   : > { %v1042_v30 = vrot.slane %v1041_v29, 2 }
  0xf9   : > { %v1043_v31 = vadd.f32 %v1042_v30, %v1041_v29  ;;  %v2814_v30 = vld [vmem:[%s3153_s30 + $0x10] sm:$0xff] }
  0xfb   : > { %v1044_v32 = vrot.slane %v1043_v31, 1 }
  0xfd   : > { %v1045_v33 = vadd.f32 %v1044_v32, %v1043_v31  ;;  %v1108_v32 = vld [vmem:[%s3610_s8] sm:$0xff]  ;;  %s2762_s8 = sld [smem:[#allocation2 + $0x11]] }
  0xff   : > { %v1046_v34 = vmul.f32 %v1045_v33, %v3339_v22  ;;  %2587 = vmatmul.msk.bf16.vlgmr.msrb.gmra.mxu0 %vm1178_vm6, %v2814_v30 }
 0x101   : > { %v1047_v35 = vadd.f32 1e-05, %v1046_v34  ;;  %v1110_v34 = vld [vmem:[%s3611_s14] sm:$0xff]  ;;  %s3492_s14 = sld [smem:[#allocation2 + $0x17]] }
 0x103   : > { %2941 = vrsqrt.f32 %v1047_v35  ;;  %vm1054_vm4 = vweird.f32 %v1047_v35 }
 0x109   : > { %v2942_v36 = vpop.eup %2941 }
 0x10a   : > { %v1049_v37 = vmul.f32 %v2942_v36, %v1047_v35  ;;  %vm1055_vm3 = vweird.f32 %v2942_v36 }
 0x10b   : > { %vm1056_vm5 = vmor %vm1054_vm4, %vm1055_vm3 }
 0x10c   : > { %v1050_v38 = vmul.f32 %v2942_v36, %v1049_v37 }
 0x10e   : > { %v1051_v40 = vmul.f32 0.5, %v1050_v38  ;;  %v1113_v38 = vld [vmem:[%s3143_s19] sm:$0xff] }
 0x110   : > { %v1052_v41 = vsub.f32 1.5, %v1051_v40 }
 0x112   : > { %v1053_v42 = vmul.f32 %v2942_v36, %v1052_v41 }
 0x114   : > { %v1057_v44 = vsel %vm1056_vm5, %v2942_v36, %v1053_v42 }
 0x115   : > { %v1058_v46 = vmul.f32 %v1057_v44, %v1037_v25 }
 0x117   : > { %v1060_v48 = vmul.f32 %v1059_v43, %v1058_v46 }
 0x119   : > { %v1062_v51 = vadd.f32 %v1061_v47, %v1060_v48  ;;  %v1128_v47 = vld [vmem:[%s3148_s24] sm:$0x1] }
 0x11b   : > { %v1063_v53 = vmax.f32 %v1062_v51, 0.0 }
 0x11d   : > { %v1073_v55 = vmul.f32 %v1072_v52, %v1063_v53 }
 0x11f   : > { %v1074_v57 = vadd.f32 %v1073_v55, %v1070_v54  ;;  %v2813_v54 = vld [vmem:[%s3597_s6 + $0x18] sm:$0xff]  ;;  %v2810_v55 = vld [vmem:[%s3597_s6 + $0x8] sm:$0xff] }
 0x120   : > { %1253 = vmatpush.bf16.msra.mxu2 %v2813_v54  ;;  %1282 = vmatpush.bf16.msra.mxu3 %v2810_v55 }
 0x121   : > { %v1077_v58 = vadd.f32 %v1076_v56, %v1074_v57  ;;  %v2816_v56 = vld [vmem:[%s3597_s6 + $0x28] sm:$0xff]  ;;  %v2812_v57 = vld [vmem:[%s3597_s6 + $0x10] sm:$0xff] }
 0x122   : > { %1342 = vmatpush.bf16.msrb.mxu1 %v2816_v56 }
 0x123   : > { %v1078_v59 = vsel %vm1021_vm1, %v1077_v58, 0.0 }
 0x124   : > { %v1079_v60 = vrot.slane %v1078_v59, 4  ;;  %1254 = vmatpush.bf16.msra.mxu2 %v2812_v57 }
 0x126   : > { %v1080_v61 = vadd.f32 %v1079_v60, %v1078_v59  ;;  %v2824_v59 = vld [vmem:[%s3612_s22 + $0x38] sm:$0xff]  ;;  %v2815_v60 = vld [vmem:[%s3597_s6 + $0x20] sm:$0xff] }
 0x127   : > { %1644 = vmatpush.bf16.msra.mxu0 %v2824_v59  ;;  %1343 = vmatpush.bf16.msrb.mxu1 %v2815_v60 }
 0x128   : > { %v1081_v62 = vrot.slane %v1080_v61, 2  ;;  %1600 = vmatpush.bf16.msrb.mxu2 %v2824_v59 }
 0x12a   : > { %v1082_v63 = vadd.f32 %v1081_v62, %v1080_v61  ;;  %v2832_v61 = vld [vmem:[%s3612_s22 + $0x78] sm:$0xff]  ;;  %v2823_v62 = vld [vmem:[%s3612_s22 + $0x30] sm:$0xff] }
 0x12b   : > { %1657 = vmatpush.bf16.msra.mxu1 %v2832_v61  ;;  %1645 = vmatpush.bf16.msra.mxu0 %v2823_v62 }
 0x12c   : > { %v1083_v0 = vrot.slane %v1082_v63, 1  ;;  %1601 = vmatpush.bf16.msrb.mxu2 %v2823_v62 }
 0x12e   : > { %v1084_v1 = vadd.f32 %v1083_v0, %v1082_v63 }
 0x130   : > { %v1085_v2 = vmul.f32 %v1084_v1, %v3339_v22 }
 0x132   : > { %v1086_v3 = vsub.f32 %v1077_v58, %v1085_v2  ;;  %v2809_v58 = vld [vmem:[%s3597_s6] sm:$0xff]  ;;  %s2761_s6 = sld [smem:[#allocation2 + $0x10]] }
 0x133   : > { %1283 = vmatpush.bf16.msra.mxu3 %v2809_v58 }
 0x134   : > { %v1087_v6 = vmul.f32 %v1086_v3, %v1086_v3 }
 0x136   : > { %v1088_v7 = vsel %vm1021_vm1, %v1087_v6, 0.0 }
 0x137   : > { %v1089_v8 = vrot.slane %v1088_v7, 4  ;;  %1613 = vmatpush.bf16.msrb.mxu3 %v2832_v61 }
 0x139   : > { %v1090_v9 = vadd.f32 %v1089_v8, %v1088_v7  ;;  %v2822_v8 = vld [vmem:[%s3612_s22 + $0x28] sm:$0xff] }
 0x13a   : > { %1646 = vmatpush.bf16.msra.mxu0 %v2822_v8  ;;  %1602 = vmatpush.bf16.msrb.mxu2 %v2822_v8 }
 0x13b   : > { %v1091_v10 = vrot.slane %v1090_v9, 2 }
 0x13d   : > { %v1092_v11 = vadd.f32 %v1091_v10, %v1090_v9  ;;  %v2830_v9 = vld [vmem:[%s3612_s22 + $0x68] sm:$0xff]  ;;  %v2821_v10 = vld [vmem:[%s3612_s22 + $0x20] sm:$0xff] }
 0x13e   : > { %1647 = vmatpush.bf16.msra.mxu0 %v2821_v10  ;;  %1603 = vmatpush.bf16.msrb.mxu2 %v2821_v10 }
 0x13f   : > { %v1093_v12 = vrot.slane %v1092_v11, 1 }
 0x141   : > { %v1094_v13 = vadd.f32 %v1093_v12, %v1092_v11  ;;  %v1149_v11 = vlaneseq }
 0x143   : > { %v1095_v19 = vmul.f32 %v1094_v13, %v3339_v22  ;;  %v1150_v17 = vshrl.u32 %v1149_v11, 7  ;;  %v1152_v18 = vand.u32 127, %v1149_v11 }
 0x145   : > { %v1096_v21 = vadd.f32 1e-05, %v1095_v19  ;;  %vm1153_vm13 = vcmp.eq.s32.totalorder %v1150_v17, %v1152_v18 }
 0x147   : > { %2943 = vrsqrt.f32 %v1096_v21  ;;  %vm1103_vm8 = vweird.f32 %v1096_v21 }
 0x14d   : > { %v2944_v25 = vpop.eup %2943 }
 0x14e   : > { %v1098_v22 = vmul.f32 %v2944_v25, %v1096_v21  ;;  %vm1104_vm7 = vweird.f32 %v2944_v25 }
 0x14f   : > { %vm1105_vm9 = vmor %vm1103_vm8, %vm1104_vm7 }
 0x150   : > { %v1099_v26 = vmul.f32 %v2944_v25, %v1098_v22 }
 0x152   : > { %v1100_v27 = vmul.f32 0.5, %v1099_v26 }
 0x154   : > { %v1101_v28 = vsub.f32 1.5, %v1100_v27 }
 0x156   : > { %v1102_v29 = vmul.f32 %v2944_v25, %v1101_v28  ;;  %v3082_v28 = vmov 0.0  }
 0x158   : > { %v1106_v31 = vsel %vm1105_vm9, %v2944_v25, %v1102_v29  ;;  %v2546_v29 = vsel %vm1153_vm13, 1.0, %v3082_v28 }
 0x159   : > { %v1107_v33 = vmul.f32 %v1106_v31, %v1086_v3  ;;  %v2831_v3 = vld [vmem:[%s3612_s22 + $0x70] sm:$0xff] }
 0x15a   : > { %1658 = vmatpush.bf16.msra.mxu1 %v2831_v3  ;;  %1614 = vmatpush.bf16.msrb.mxu3 %v2831_v3 }
 0x15b   : > { %v1109_v35 = vmul.f32 %v1108_v32, %v1107_v33  ;;  %v2820_v33 = vld [vmem:[%s3612_s22 + $0x18] sm:$0xff] }
 0x15c   : > { %1648 = vmatpush.bf16.msra.mxu0 %v2820_v33  ;;  %1604 = vmatpush.bf16.msrb.mxu2 %v2820_v33 }
 0x15d   : > { %v1111_v36 = vadd.f32 %v1110_v34, %v1109_v35  ;;  %v2828_v34 = vld [vmem:[%s3612_s22 + $0x58] sm:$0xff]  ;;  %v2819_v35 = vld [vmem:[%s3612_s22 + $0x10] sm:$0xff] }
 0x15e   : > { %1659 = vmatpush.bf16.msra.mxu1 %v2830_v9  ;;  %1615 = vmatpush.bf16.msrb.mxu3 %v2830_v9 }
 0x15f   : > { %v1112_v37 = vmax.f32 %v1111_v36, 0.0  ;;  %v2827_v36 = vld [vmem:[%s3612_s22 + $0x50] sm:$0xff] }
 0x160   : > { %1649 = vmatpush.bf16.msra.mxu0 %v2819_v35  ;;  %1605 = vmatpush.bf16.msrb.mxu2 %v2819_v35 }
 0x161   : > { %1116 = vperm.xlu1 %2936, %v1112_v37   ;;  %v2818_v37 = vld [vmem:[%s3612_s22 + $0x8] sm:$0xff] }
 0x162   : > { %1660 = vmatpush.bf16.msra.mxu1 %v2829_v14  ;;  %1616 = vmatpush.bf16.msrb.mxu3 %v2829_v14 }
 0x164   : > { %1650 = vmatpush.bf16.msra.mxu0 %v2818_v37  ;;  %1606 = vmatpush.bf16.msrb.mxu2 %v2818_v37 }
 0x166   : > { %1661 = vmatpush.bf16.msra.mxu1 %v2828_v34  ;;  %1617 = vmatpush.bf16.msrb.mxu3 %v2828_v34  ;;  %v3427_v34 = vld [vmem:[%s3614_s16] sm:$0xff] }
 0x16a   : > { %1662 = vmatpush.bf16.msra.mxu1 %v2827_v36  ;;  %1618 = vmatpush.bf16.msrb.mxu3 %v2827_v36 }
 0x16c   : > { %v1191_v52 = vpop.f32.mrf.mxu0  ;;  %v1221_v53 = vpop.f32.mrf.mxu1 }
 0x174   : > { %v1193_v1 = vpop.f32.mrf.mxu0  ;;  %v1223_v2 = vpop.f32.mrf.mxu1 }
 0x175   : > { %v1200_v6 = vpack.c.bf16 %v1193_v1, %v1191_v52  ;;  %v1231_v7 = vpack.c.bf16 %v1223_v2, %v1221_v53 }
 0x177   : > { %2571 = vmatmul.msk.bf16.vlgmr.msra.gmra.mxu2 %vm1178_vm6, %v1231_v7  ;;  %2580 = vmatmul.msk.bf16.vlgmr.msra.gmra.mxu3 %vm1178_vm6, %v1200_v6 }
 0x17c   : > { %v1310_v13 = vpop.f32.mrf.mxu0 }
 0x184   : > { %v1312_v25 = vpop.f32.mrf.mxu0 }
 0x185   : > { %v1320_v26 = vpack.c.bf16 %v1312_v25, %v1310_v13 }
 0x187   : > { %2600 = vmatmul.msk.bf16.vlgmr.msrb.gmra.mxu1 %vm1178_vm6, %v1320_v26 }
 0x1d3   : > { %v1117_v39 = vpop.permute.xlu1 %1116 }
 0x1d4   : > { %v1119_v40 = vmul.f32 %v1117_v39, %v1113_v38  ;;  %v2826_v38 = vld [vmem:[%s3612_s22 + $0x48] sm:$0xff]  ;;  %v2817_v39 = vld [vmem:[%s3612_s22] sm:$0xff] }
 0x1d5   : > { %1663 = vmatpush.bf16.msra.mxu1 %v2826_v38  ;;  %1619 = vmatpush.bf16.msrb.mxu3 %v2826_v38 }
 0x1d6   : > { %v1121_v41 = vsel %vm1120_vm10, %v1119_v40, 0.0  ;;  %v2825_v40 = vld [vmem:[%s3612_s22 + $0x40] sm:$0xff]  ;;  %1651 = vmatpush.bf16.msra.mxu0 %v2817_v39  ;;  %1607 = vmatpush.bf16.msrb.mxu2 %v2817_v39  ;;  %v3430_v39 = vld [vmem:[%s3614_s16 + $0x8] sm:$0xff] }
 0x1d7   : > { %v1122_v42 = vrot.slane %v1121_v41, 4 }
 0x1d9   : > { %v1123_v43 = vadd.f32 %v1122_v42, %v1121_v41  ;;  %1664 = vmatpush.bf16.msra.mxu1 %v2825_v40  ;;  %v3394_v41 = vld [vmem:[%s981_s18] sm:$0xff]  ;;  %v3396_v42 = vld [vmem:[%s981_s18 + $0x8] sm:$0xff]  ;;  %1620 = vmatpush.bf16.msrb.mxu3 %v2825_v40  ;;  %s3413_s18 = sld [smem:[#allocation2 + $0x3]] }
 0x1db   : > { %v1124_v44 = vrot.slane %v1123_v43, 2 }
 0x1dd   : > { %v1125_v45 = vadd.f32 %v1124_v44, %v1123_v43  ;;  %v1412_v43 = vrot.slane %v3394_v41, 4  ;;  %v1418_v44 = vrot.slane %v3396_v42, 4 }
 0x1df   : > { %v1126_v46 = vrot.slane %v1125_v45, 1 }
 0x1e1   : > { %v1127_v48 = vadd.f32 %v1126_v46, %v1125_v45  ;;  %v1441_v45 = vmax.f32 %v3394_v41, %v1412_v43  ;;  %v1447_v46 = vmax.f32 %v3396_v42, %v1418_v44 }
 0x1e3   : > { %v1129_v50 = vadd.f32 %v1128_v47, %v1127_v48  ;;  %v1419_v47 = vadd.f32 %v1418_v44, %v3396_v42  ;;  %v1413_v48 = vadd.f32 %v1412_v43, %v3394_v41 }
 0x1e5   : > { %v2545_v51 = vmul.f32 -1.442695, %v1129_v50  ;;  %v1442_v50 = vrot.slane %v1441_v45, 2  ;;  %v1420_v52 = vrot.slane %v1419_v47, 2  ;;  %v1414_v53 = vrot.slane %v1413_v48, 2 }
 0x1e7   : > { %2945 = vpow2.f32 %v2545_v51  ;;  %v1448_v51 = vrot.slane %v1447_v46, 2  ;;  %v1443_v55 = vmax.f32 %v1441_v45, %v1442_v50  ;;  %v1421_v60 = vadd.f32 %v1420_v52, %v1419_v47 }
 0x1e8   : > { %v1415_v61 = vadd.f32 %v1414_v53, %v1413_v48 }
 0x1e9   : > { %v1449_v56 = vmax.f32 %v1447_v46, %v1448_v51  ;;  %v1422_v3 = vrot.slane %v1421_v60, 1 }
 0x1ea   : > { %v1416_v6 = vrot.slane %v1415_v61, 1 }
 0x1eb   : > { %v1450_v1 = vrot.slane %v1449_v56, 1 }
 0x1ed   : > { %v2946_v63 = vpop.eup %2945 }
 0x1ee   : > { %v1133_v0 = vadd.f32 1.0, %v2946_v63 }
 0x1f0   : > { %2947 = vrcp.f32 %v1133_v0  ;;  %v1145_v19 = vand.u32 2147483648, %v1133_v0  ;;  %v1143_v21 = vand.u32 2147483647, %v1133_v0  ;;  %vm1139_vm12 = vweird.f32 %v1133_v0 }
 0x1f2   : > { %v1146_v24 = vor.u32 1.1754944e-38, %v1145_v19  ;;  %vm1144_vm15 = vcmp.eq.f32.partialorder %v1143_v21, 8.507059e+37  ;;  %v1423_v19 = vadd.f32 %v1422_v3, %v1421_v60 }
 0x1f6   : > { %v2948_v12 = vpop.eup %2947 }
 0x1f7   : > { %v1135_v15 = vmul.f32 %v2948_v12, %v1133_v0  ;;  %vm1140_vm11 = vweird.f32 %v2948_v12  ;;  %v1444_v0 = vrot.slane %v1443_v55, 1 }
 0x1f8   : > { %vm1141_vm14 = vmor %vm1139_vm12, %vm1140_vm11 }
 0x1f9   : > { %v1136_v16 = vsub.f32 1.0, %v1135_v15  ;;  %v1445_v11 = vmax.f32 %v1443_v55, %v1444_v0 }
 0x1fa   : > { %v1256_v13 = vpop.f32.mrf.mxu2  ;;  %v1285_v14 = vpop.f32.mrf.mxu3 }
 0x1fb   : > { %v1137_v20 = vmul.f32 %v2948_v12, %v1136_v16  ;;  %v1286_v21 = vadd.f32 %v1285_v14, %v1256_v13 }
 0x1fd   : > { %v1138_v23 = vadd.f32 %v2948_v12, %v1137_v20  ;;  %v1417_v20 = vadd.f32 %v1416_v6, %v1415_v61 }
 0x1ff   : > { %v1142_v22 = vsel %vm1141_vm14, %v2948_v12, %v1138_v23  ;;  %v1451_v12 = vmax.f32 %v1449_v56, %v1450_v1  ;;  %v3440_v1 = vld [vmem:[%s3614_s16 + $0x10] sm:$0xff] }
 0x200   : > { %v1147_v27 = vsel %vm1144_vm15, %v1146_v24, %v1142_v22  ;;  %v1353_v24 = vstv %s3413_s18  ;;  %s3616_s18 = sld [smem:[#allocation16_spill]] }
 0x201   : > { %v1156_v30 = vperm.slane %v1147_v27, 0 }
 0x202   : > { %v1258_v51 = vpop.f32.mrf.mxu2  ;;  %v1287_v52 = vpop.f32.mrf.mxu3 }
 0x203   : > { %v1157_v31 = vmul.f32 %v2546_v29, %v1156_v30  ;;  %v1357_v29 = vstv %s3418_s11  ;;  %s2681_s11 = sld [smem:[#allocation2 + $0x5]] }
 0x204   : > { %v1345_v23 = vpop.f32.mrf.mxu1 }
 0x205   : > { %v1158_v32 = vsel %vm1120_vm10, %v1157_v31, 0.0  ;;  %v1350_v28 = vadd.f32 %v1345_v23, %v1286_v21 }
 0x206   : > { %1159 = vadd.xlane.f32.xlu1 %v1158_v32 }
 0x207   : > { %v1354_v35 = vmul.f32 %v1353_v24, %v1350_v28 }
 0x209   : > { %v3432_v43 = vadd.f32 %v1357_v29, %v1354_v35 }
 0x20b   : > { %v2603_v55 = vmul.f32 -1.442695, %v3432_v43 }
 0x20c   : > { %v1347_v61 = vpop.f32.mrf.mxu1 }
 0x20d   : > { %2949 = vpow2.f32 %v2603_v55 }
 0x213   : > { %v2950_v3 = vpop.eup %2949 }
 0x279   : > { %v1160_v54 = vpop.xlane.xlu1 %1159 }
 0x27a   : > { %v3407_v57 = vmul.f32 %v1160_v54, %v3330_v4  ;;  %v3410_v58 = vmul.f32 %v1160_v54, %v3333_v5  ;;  %v1163_v59 = vmul.f32 %v1160_v54, %v3346_v49 }
 0x27c   : > { %1164 = vst.msk [vmem:[%s1003_s23] sm:$0xff] %vm1021_vm1, %v1163_v59  ;;  %v1400_v62 = vrot.slane %v3407_v57, 4  ;;  %v1406_v63 = vrot.slane %v3410_v58, 4  ;;  %s3615_s23 = sld [smem:[#allocation18_spill]] }
 0x27e   : > { %v1401_v4 = vadd.f32 %v1400_v62, %v3407_v57  ;;  %v1407_v5 = vadd.f32 %v1406_v63, %v3410_v58  ;;  %v1429_v49 = vmax.f32 %v3407_v57, %v1400_v62  ;;  %v1435_v2 = vmax.f32 %v3410_v58, %v1406_v63 }
 0x27f   : > { %v1288_v62 = vadd.f32 %v1287_v52, %v1258_v51 }
 0x280   : > { %v1402_v7 = vrot.slane %v1401_v4, 2  ;;  %v1408_v8 = vrot.slane %v1407_v5, 2  ;;  %v1430_v9 = vrot.slane %v1429_v49, 2  ;;  %v1436_v10 = vrot.slane %v1435_v2, 2 }
 0x281   : > { %v1351_v0 = vadd.f32 %v1347_v61, %v1288_v62 }
 0x282   : > { %v1403_v15 = vadd.f32 %v1402_v7, %v1401_v4  ;;  %v1409_v16 = vadd.f32 %v1408_v8, %v1407_v5  ;;  %v1431_v17 = vmax.f32 %v1429_v49, %v1430_v9  ;;  %v1437_v18 = vmax.f32 %v1435_v2, %v1436_v10  ;;  %v3443_v4 = vld [vmem:[%s3614_s16 + $0x18] sm:$0xff] }
 0x283   : > { %v1355_v5 = vmul.f32 %v1353_v24, %v1351_v0  ;;  %v2837_v7 = vld [vmem:[%s3615_s23 + $0x18] sm:$0xff]  ;;  %v1366_v8 = vadd.f32 1.0, %v2950_v3 }
 0x284   : > { %v1432_v25 = vrot.slane %v1431_v17, 1  ;;  %v1438_v22 = vrot.slane %v1437_v18, 1  ;;  %v1410_v26 = vrot.slane %v1409_v16, 1  ;;  %v1404_v27 = vrot.slane %v1403_v15, 1  ;;  %1791 = vmatpush.bf16.msrb.mxu1 %v2837_v7 }
 0x285   : > { %v1359_v6 = vadd.f32 %v1357_v29, %v1355_v5  ;;  %2951 = vrcp.f32 %v1366_v8  ;;  %vm1373_vm1 = vweird.f32 %v1366_v8  ;;  %v1379_v21 = vand.u32 2147483648, %v1366_v8 }
 0x286   : > { %v1433_v30 = vmax.f32 %v1431_v17, %v1432_v25  ;;  %v1439_v31 = vmax.f32 %v1437_v18, %v1438_v22  ;;  %v1411_v32 = vadd.f32 %v1410_v26, %v1409_v16  ;;  %v1405_v33 = vadd.f32 %v1404_v27, %v1403_v15 }
 0x287   : > { %v2604_v9 = vmul.f32 -1.442695, %v1359_v6  ;;  %v1380_v22 = vor.u32 1.1754944e-38, %v1379_v21 }
 0x288   : > { %v1452_v36 = vmax.f32 %v1433_v30, %v1445_v11  ;;  %v1453_v37 = vmax.f32 %v1439_v31, %v1451_v12  ;;  %v1425_v38 = vadd.f32 %v1423_v19, %v1411_v32  ;;  %v1424_v40 = vadd.f32 %v1417_v20, %v1405_v33 }
 0x289   : > { %2953 = vpow2.f32 %v2604_v9  ;;  %v1377_v20 = vand.u32 2147483647, %v1366_v8 }
 0x28a   : > { %v1642_v44 = vpack.c.bf16 %v1452_v36, %v1452_v36  ;;  %v1643_v45 = vpack.c.bf16 %v1453_v37, %v1453_v37  ;;  %v1427_v46 = vmul.f32 0.0625, %v1425_v38  ;;  %v1630_v47 = vmul.f32 %v3427_v34, %v1452_v36 }
 0x28b   : > { %v1631_v48 = vmul.f32 %v3430_v39, %v1453_v37  ;;  %v1426_v50 = vmul.f32 0.0625, %v1424_v40  ;;  %v1632_v11 = vmul.f32 %v3440_v1, %v1452_v36  ;;  %v1633_v12 = vmul.f32 %v3443_v4, %v1453_v37  ;;  %v2952_v13 = vpop.eup %2951 }
 0x28c   : > { %1652 = vmatmul.bf16.vlgmr.msra.gmra.mxu0 %v1642_v44  ;;  %1665 = vmatmul.bf16.vlgmr.msra.gmra.mxu1 %v1643_v45  ;;  %v1503_v53 = vpack.c.bf16 %v1427_v46, %v1427_v46  ;;  %v1459_v54 = vmul.f32 %v3430_v39, %v1427_v46  ;;  %v1461_v2 = vmul.f32 %v3443_v4, %v1427_v46  ;;  %vm1374_vm2 = vweird.f32 %v2952_v13  ;;  %v2834_v44 = vld [vmem:[%s3616_s18 + $0x8] sm:$0xff]  ;;  %v2833_v45 = vld [vmem:[%s3616_s18] sm:$0xff] }
 0x28d   : > { %v1634_v56 = vadd.f32 %v1631_v48, %v1630_v47  ;;  %v1502_v59 = vpack.c.bf16 %v1426_v50, %v1426_v50  ;;  %v1458_v60 = vmul.f32 %v3427_v34, %v1426_v50  ;;  %v1460_v49 = vmul.f32 %v3440_v1, %v1426_v50  ;;  %vm1375_vm3 = vmor %vm1373_vm1, %vm1374_vm2  ;;  %1697 = vmatpush.bf16.msra.mxu2 %v2834_v44  ;;  %v2840_v46 = vld [vmem:[%s3615_s23 + $0x20] sm:$0xff] }
 0x28e   : > { %1621 = vmatmul.bf16.vlgmr.msrb.gmra.mxu3 %v1503_v53  ;;  %v1369_v15 = vmul.f32 %v2952_v13, %v1366_v8  ;;  %v1637_v16 = vadd.f32 %v1633_v12, %v1632_v11  ;;  %vm1378_vm4 = vcmp.eq.f32.partialorder %v1377_v20, 8.507059e+37  ;;  %v1732_v20 = vstv %s2682_s3  ;;  %s2684_s3 = sld [smem:[#allocation2 + $0x8]] }
 0x28f   : > { %1635 = vadd.xlane.f32.xlu0 %v1634_v56  ;;  %1608 = vmatmul.bf16.vlgmr.msrb.gmra.mxu2 %v1502_v59  ;;  %v1462_v63 = vadd.f32 %v1459_v54, %v1458_v60  ;;  %v1465_v10 = vadd.f32 %v1461_v2, %v1460_v49  ;;  %v2954_v14 = vpop.eup %2953 }
 0x290   : > { %v1367_v17 = vadd.f32 1.0, %v2954_v14  ;;  %v1370_v18 = vsub.f32 1.0, %v1369_v15  ;;  %1720 = vmatpush.bf16.msra.mxu3 %v2833_v45 }
 0x291   : > { %1463 = vadd.xlane.f32.xlu2 %v1462_v63 }
 0x292   : > { %2955 = vrcp.f32 %v1367_v17  ;;  %v1371_v19 = vmul.f32 %v2952_v13, %v1370_v18  ;;  %vm1388_vm5 = vweird.f32 %v1367_v17  ;;  %v1394_v26 = vand.u32 2147483648, %v1367_v17 }
 0x293   : > { %v1392_v29 = vand.u32 2147483647, %v1367_v17  ;;  %v1728_v18 = vstv %s2681_s11  ;;  %s3620_s11 = sld [smem:[#allocation22_spill]] }
 0x294   : > { %v1372_v23 = vadd.f32 %v2952_v13, %v1371_v19  ;;  %v1395_v32 = vor.u32 1.1754944e-38, %v1394_v26  ;;  %1843 = vmatpush.bf16.msrb.mxu3 %v2840_v46 }
 0x295   : > { %vm1393_vm8 = vcmp.eq.f32.partialorder %v1392_v29, 8.507059e+37 }
 0x296   : > { %v1376_v27 = vsel %vm1375_vm3, %v2952_v13, %v1372_v23  ;;  %v2843_v13 = vld [vmem:[%s3615_s23 + $0x28] sm:$0xff] }
 0x297   : > { %v1381_v31 = vsel %vm1378_vm4, %v1380_v22, %v1376_v27  ;;  %v1736_v22 = vstv %s2683_s5  ;;  %s3618_s5 = sld [smem:[#allocation19_spill]] }
 0x298   : > { %v2956_v24 = vpop.eup %2955  ;;  %v1398_v35 = vmul.f32 %v1381_v31, %v3432_v43 }
 0x299   : > { %1466 = vadd.xlane.f32.xlu2 %v1465_v10  ;;  %v1384_v25 = vmul.f32 %v2956_v24, %v1367_v17  ;;  %vm1389_vm6 = vweird.f32 %v2956_v24 }
 0x29a   : > { %vm1390_vm7 = vmor %vm1388_vm5, %vm1389_vm6 }
 0x29b   : > { %v1385_v28 = vsub.f32 1.0, %v1384_v25 }
 0x29d   : > { %v1386_v30 = vmul.f32 %v2956_v24, %v1385_v28 }
 0x29f   : > { %v1387_v33 = vadd.f32 %v2956_v24, %v1386_v30 }
 0x2a1   : > { %1638 = vadd.xlane.f32.xlu2 %v1637_v16  ;;  %v1391_v36 = vsel %vm1390_vm7, %v2956_v24, %v1387_v33  ;;  %v2835_v33 = vld [vmem:[%s3617_s4] sm:$0xff]  ;;  %s3619_s4 = sld [smem:[#allocation20_spill]] }
 0x2a2   : > { %v1396_v37 = vsel %vm1393_vm8, %v1395_v32, %v1391_v36  ;;  %v2839_v36 = vld [vmem:[%s3615_s23 + $0x8] sm:$0xff] }
 0x2a3   : > { %v1399_v38 = vmul.f32 %v1396_v37, %v1359_v6  ;;  %v2842_v37 = vld [vmem:[%s3615_s23 + $0x10] sm:$0xff] }
 0x2a5   : > { %v1774_v40 = vpack.c.bf16 %v1399_v38, %v1398_v35  ;;  %v2836_v35 = vld [vmem:[%s3615_s23] sm:$0xff] }
 0x2a6   : > { %1814 = vmatpush.bf16.msrb.mxu2 %v2836_v35 }
 0x2a7   : > { %2696 = vmatmul.msk.bf16.vlgmr.msrb.gmra.mxu1 %vm1015_vm0, %v1774_v40 }
 0x302   : > { %v1636_v54 = vpop.xlane.xlu0 %1635 }
 0x303   : > { %v1640_v63 = vmul.f32 0.0625, %v1636_v54 }
 0x304   : > { %v1464_v47 = vpop.xlane.xlu2 %1463 }
 0x305   : > { %v1468_v49 = vmul.f32 0.0625, %v1464_v47 }
 0x309   : > { %v1653_v48 = vpop.f32.mrf.mxu0  ;;  %v1666_v50 = vpop.f32.mrf.mxu1 }
 0x30a   : > { %v1667_v51 = vadd.f32 %v1666_v50, %v1653_v48 }
 0x30c   : > { %v1467_v52 = vpop.xlane.xlu2 %1466  ;;  %v1670_v53 = vmul.f32 0.0625, %v1667_v51 }
 0x30d   : > { %v1469_v3 = vmul.f32 0.0625, %v1467_v52 }
 0x30e   : > { %v1671_v60 = vperm.slane %v1670_v53, 0 }
 0x310   : > { %v1672_v2 = vadd.f32 %v1671_v60, %v1640_v63 }
 0x311   : > { %v1622_v43 = vpop.f32.mrf.mxu3  ;;  %v1655_v55 = vpop.f32.mrf.mxu0 }
 0x312   : > { %v1609_v56 = vpop.f32.mrf.mxu2  ;;  %v1668_v59 = vpop.f32.mrf.mxu1 }
 0x313   : > { %v1623_v61 = vadd.f32 %v1622_v43, %v1609_v56  ;;  %v2841_v59 = vld [vmem:[%s3618_s5 + $0x8] sm:$0xff] }
 0x314   : > { %v1639_v62 = vpop.xlane.xlu2 %1638 }
 0x315   : > { %v1626_v0 = vmul.f32 0.0625, %v1623_v61  ;;  %v1641_v5 = vmul.f32 0.0625, %v1639_v62 }
 0x317   : > { %v1627_v6 = vperm.slane %v1626_v0, 0  ;;  %v1673_v7 = vadd.f32 %v1671_v60, %v1641_v5 }
 0x319   : > { %v1628_v8 = vadd.f32 %v1627_v6, %v1468_v49  ;;  %v1629_v9 = vadd.f32 %v1627_v6, %v1469_v3  ;;  %v1680_v10 = vpack.c.bf16 %v1673_v7, %v1672_v2  ;;  %v1624_v11 = vpop.f32.mrf.mxu3  ;;  %v2838_v2 = vld [vmem:[%s3618_s5] sm:$0xff] }
 0x31a   : > { %v1611_v12 = vpop.f32.mrf.mxu2  ;;  %v2845_v11 = vld [vmem:[%s3619_s4] sm:$0xff]  ;;  %s2775_s4 = sld [smem:[#allocation2 + $0x14]] }
 0x31b   : > { %v1676_v14 = vpack.c.bf16 %v1629_v9, %v1628_v8  ;;  %2675 = vmatmul.msk.bf16.vlgmr.msra.gmra.mxu2 %vm1015_vm0, %v1680_v10  ;;  %v2844_v10 = vld [vmem:[%s3618_s5 + $0x10] sm:$0xff]  ;;  %v2847_v12 = vld [vmem:[%s3620_s11] sm:$0xff]  ;;  %s2755_s11 = sld [smem:[#allocation2 + $0xf]] }
 0x31c   : > { %s2776_s5 = sld [smem:[#allocation2 + $0x15]] }
 0x31d   : > { %2680 = vmatmul.msk.bf16.vlgmr.msra.gmra.mxu3 %vm1015_vm0, %v1676_v14 }
 0x31e   : > { %1937 = vmatpush.bf16.msra.mxu3 %v2843_v13 }
 0x324   : > { %v1793_v51 = vpop.f32.mrf.mxu1 }
 0x32c   : > { %v1795_v60 = vpop.f32.mrf.mxu1 }
 0x32d   : > { %2710 = vmatmul.msk.bf16.vlgmr.msrb.gmra.mxu3 %vm1015_vm0, %v1774_v40 }
 0x33d   : > { %2736 = vmatmul.msk.bf16.vlgmr.msra.gmra.mxu3 %vm1015_vm0, %v1774_v40  ;;  %v1745_v40 = vstv %s2684_s3  ;;  %s2769_s3 = sld [smem:[#allocation2 + $0x13]] }
 0x39e   : > { %v1699_v15 = vpop.f32.mrf.mxu2 }
 0x3a0   : > { %v1722_v16 = vpop.f32.mrf.mxu3 }
 0x3a1   : > { %v1723_v17 = vadd.f32 %v1722_v16, %v1699_v15 }
 0x3a3   : > { %v1729_v19 = vadd.f32 %v1728_v18, %v1723_v17 }
 0x3a5   : > { %v1733_v24 = vmul.f32 %v1732_v20, %v1729_v19 }
 0x3a6   : > { %v1701_v21 = vpop.f32.mrf.mxu2 }
 0x3a7   : > { %v1737_v27 = vadd.f32 %v1736_v22, %v1733_v24 }
 0x3a8   : > { %v1724_v23 = vpop.f32.mrf.mxu3 }
 0x3a9   : > { %v1725_v25 = vadd.f32 %v1724_v23, %v1701_v21  ;;  %v1739_v30 = vmax.f32 %v1737_v27, 0.0  ;;  %v2108_v27 = vstv %s2775_s4  ;;  %s2752_s4 = sld [smem:[#allocation2 + $0xc]] }
 0x3ab   : > { %v1730_v26 = vadd.f32 %v1728_v18, %v1725_v25  ;;  %v2086_v25 = vstv %s2769_s3  ;;  %s3622_s3 = sld [smem:[#allocation21_spill]] }
 0x3ad   : > { %v1734_v28 = vmul.f32 %v1732_v20, %v1730_v26 }
 0x3af   : > { %v1738_v29 = vadd.f32 %v1736_v22, %v1734_v28  ;;  %v2022_v28 = vstv %s2755_s11  ;;  %s3488_s11 = sld [smem:[#allocation2 + $0xe]] }
 0x3b0   : > { %v1845_v48 = vpop.f32.mrf.mxu3 }
 0x3b1   : > { %v1740_v31 = vmax.f32 %v1738_v29, 0.0 }
 0x3b3   : > { %v1743_v32 = vpack.c.bf16 %v1740_v31, %v1739_v30  ;;  %v2112_v31 = vstv %s2776_s5  ;;  %s2751_s5 = sld [smem:[#allocation2 + $0xb]] }
 0x3b5   : > { %1761 = vmatpush.bf16.msrb.mxu0 %v1743_v32 }
 0x3b8   : > { %2689 = vmatmul.msk.bf16.vlgmr.msrb.gmra.mxu0 %vm1015_vm0, %v2835_v33  ;;  %v1847_v52 = vpop.f32.mrf.mxu3 }
 0x3b9   : > { %1863 = vmatpush.bf16.msra.mxu0 %v2839_v36  ;;  %v2047_v36 = vstv %s2761_s6  ;;  %s2750_s6 = sld [smem:[#allocation2 + $0xa]] }
 0x3bd   : > { %1957 = vmatpush.bf16.msrb.mxu0 %v2842_v37 }
 0x3c0   : > { %v1939_v61 = vpop.f32.mrf.mxu3 }
 0x3c8   : > { %v1941_v3 = vpop.f32.mrf.mxu3 }
 0x435   : > { %v1763_v38 = vpop.f32.mrf.mxu0 }
 0x436   : > { %v3465_v45 = vadd.f32 %v1763_v38, %v1745_v40 }
 0x43d   : > { %v1765_v44 = vpop.f32.mrf.mxu0 }
 0x43e   : > { %v3467_v46 = vadd.f32 %v1765_v44, %v1745_v40 }
 0x440   : > { %v1770_v47 = vpack.c.bf16 %v3467_v46, %v3465_v45 }
 0x442   : > { %2701 = vmatmul.msk.bf16.vlgmr.msrb.gmra.mxu2 %vm1015_vm0, %v1770_v47  ;;  %2715 = vmatmul.msk.bf16.vlgmr.msra.gmra.mxu0 %vm1015_vm0, %v1770_v47 }
 0x443   : > { %2100 = vmatpush.bf16.msra.mxu0 %v2847_v12 }
 0x452   : > { %2741 = vmatmul.msk.bf16.vlgmr.msrb.gmra.mxu0 %vm1015_vm0, %v1770_v47  ;;  %v2051_v47 = vstv %s2762_s8  ;;  %s2749_s8 = sld [smem:[#allocation2 + $0x9]] }
 0x4bf   : > { %v1865_v50 = vpop.f32.mrf.mxu0 }
 0x4c0   : > { %v1866_v43 = vadd.f32 %v1865_v50, %v1845_v48 }
 0x4c5   : > { %v1816_v53 = vpop.f32.mrf.mxu2 }
 0x4c6   : > { %v1817_v63 = vadd.f32 %v1816_v53, %v1793_v51 }
 0x4c7   : > { %v1867_v54 = vpop.f32.mrf.mxu0 }
 0x4c8   : > { %v1868_v55 = vadd.f32 %v1867_v54, %v1847_v52 }
 0x4ca   : > { %v1873_v56 = vpack.c.bf16 %v1868_v55, %v1866_v43  ;;  %v2848_v55 = vld [vmem:[%s3621_s13] sm:$0xff]  ;;  %s2753_s13 = sld [smem:[#allocation2 + $0xd]] }
 0x4cc   : > { %1889 = vmatpush.bf16.msra.mxu1 %v1873_v56 }
 0x4cd   : > { %v1818_v62 = vpop.f32.mrf.mxu2 }
 0x4ce   : > { %v1819_v0 = vadd.f32 %v1818_v62, %v1795_v60  ;;  %v2846_v62 = vld [vmem:[%s3622_s3] sm:$0xff]  ;;  %s3490_s3 = sld [smem:[#allocation2 + $0x16]] }
 0x4cf   : > { %2722 = vmatmul.msk.bf16.vlgmr.msra.gmra.mxu1 %vm1015_vm0, %v2841_v59  ;;  %v1959_v5 = vpop.f32.mrf.mxu0 }
 0x4d0   : > { %v1823_v49 = vpack.c.bf16 %v1819_v0, %v1817_v63  ;;  %v1960_v7 = vadd.f32 %v1959_v5, %v1939_v61  ;;  %v1993_v63 = vstv %s2749_s8  ;;  %v1997_v5 = vstv %s2750_s6  ;;  %s3494_s8 = sld [smem:[#allocation2 + $0x12]] }
 0x4d1   : > { %s3496_s6 = sld [smem:[#allocation2 + $0x18]]  ;;  %v2011_v12 = vstv %s2753_s13 }
 0x4d2   : > { %1911 = vmatpush.bf16.msra.mxu2 %v1823_v49 }
 0x4d5   : > { %2727 = vmatmul.msk.bf16.vlgmr.msra.gmra.mxu2 %vm1015_vm0, %v2838_v2  ;;  %v2001_v2 = vstv %s2751_s5  ;;  %s3498_s5 = sld [smem:[#allocation2 + $0x19]] }
 0x4d6   : > { %2039 = vmatpush.bf16.msrb.mxu2 %v2845_v11 }
 0x4d7   : > { %v1961_v6 = vpop.f32.mrf.mxu0 }
 0x4d8   : > { %v1962_v8 = vadd.f32 %v1961_v6, %v1941_v3 }
 0x4da   : > { %v1967_v9 = vpack.c.bf16 %v1962_v8, %v1960_v7  ;;  %v2005_v7 = vstv %s2752_s4  ;;  %s3623_s4 = sld [smem:[#allocation25_spill]] }
 0x4dc   : > { %1983 = vmatpush.bf16.msrb.mxu1 %v1967_v9 }
 0x4df   : > { %2748 = vmatmul.msk.bf16.vlgmr.msrb.gmra.mxu1 %vm1015_vm0, %v2844_v10 }
 0x54c   : > { %v1891_v13 = vpop.f32.mrf.mxu1 }
 0x554   : > { %v1893_v14 = vpop.f32.mrf.mxu1 }
 0x558   : > { %v1913_v15 = vpop.f32.mrf.mxu2 }
 0x559   : > { %v1914_v18 = vadd.f32 %v1913_v15, %v1891_v13  ;;  %v2015_v15 = vstv %s3488_s11 }
 0x55c   : > { %v1985_v16 = vpop.f32.mrf.mxu1 }
 0x55d   : > { %v1990_v21 = vadd.f32 %v1985_v16, %v1914_v18  ;;  %v2121_v16 = vstv %s3490_s3  ;;  %v2060_v18 = vstv %s3494_s8  ;;  %s2851_s3 = sshll.u32 %s3261_s0, 4 }
 0x55e   : > { %s2311_s8 = scalar_lea.hbm %s3238_s12, %s2851_s3 }
 0x55f   : > { %v1994_v0 = vmul.f32 %v1993_v63, %v1990_v21 }
 0x560   : > { %v1915_v17 = vpop.f32.mrf.mxu2 }
 0x561   : > { %v1916_v19 = vadd.f32 %v1915_v17, %v1893_v14  ;;  %v1998_v49 = vadd.f32 %v1997_v5, %v1994_v0 }
 0x563   : > { %v2002_v3 = vmul.f32 %v2001_v2, %v1998_v49 }
 0x564   : > { %v1987_v20 = vpop.f32.mrf.mxu1 }
 0x565   : > { %v1991_v23 = vadd.f32 %v1987_v20, %v1916_v19  ;;  %v2006_v8 = vadd.f32 %v2005_v7, %v2002_v3 }
 0x567   : > { %v2020_v24 = vpack.c.bf16 %v1991_v23, %v1990_v21  ;;  %v1995_v6 = vmul.f32 %v1993_v63, %v1991_v23  ;;  %v2008_v10 = vmax.f32 %v2006_v8, 0.0 }
 0x569   : > { %2760 = vmatmul.msk.bf16.vlgmr.msrb.gmra.mxu2 %vm1015_vm0, %v2020_v24  ;;  %2774 = vmatmul.msk.bf16.vlgmr.msra.gmra.mxu0 %vm1015_vm0, %v2020_v24  ;;  %v1999_v9 = vadd.f32 %v1997_v5, %v1995_v6  ;;  %v2012_v14 = vmul.f32 %v2011_v12, %v2008_v10  ;;  %v2145_v24 = vstv %s3492_s14  ;;  %s969_s14 = sand.u32 1, %s3040_s10  }
 0x56a   : > { %s2531_s13 = sshll.u32 %s969_s14, 4 }
 0x56b   : > { %v2003_v11 = vmul.f32 %v2001_v2, %v1999_v9  ;;  %v2016_v20 = vadd.f32 %v2015_v15, %v2012_v14  ;;  %s971_s11 = scalar_lea.vmem [#allocation5], %s2531_s13  ;;  %s2291_s13 = scalar_lea.sflag [#allocation3], %s969_s14 }
 0x56d   : > { %v2007_v13 = vadd.f32 %v2005_v7, %v2003_v11 }
 0x56f   : > { %v2009_v19 = vmax.f32 %v2007_v13, 0.0 }
 0x5e6   : > { %v2102_v22 = vpop.f32.mrf.mxu0 }
 0x5e7   : > { %v2103_v26 = vadd.f32 %v2102_v22, %v2086_v25  ;;  %v2155_v22 = vstv %s3498_s5  ;;  %s2314_s5 = sshll.u32 %s2311_s8, 4  ;;  %s2315_s5 = int_to_ptr.hbm [resolvable:$true] %s2314_s5 }
 0x5e9   : > { %v2109_v30 = vmul.f32 %v2108_v27, %v2103_v26 }
 0x5eb   : > { %v2113_v37 = vadd.f32 %v2112_v31, %v2109_v30  ;;  %v2013_v30 = vmul.f32 %v2011_v12, %v2009_v19 }
 0x5ec   : > { %v2041_v29 = vpop.f32.mrf.mxu2 }
 0x5ed   : > { %v2042_v33 = vadd.f32 %v2041_v29, %v2022_v28  ;;  %v2115_v50 = vmax.f32 %v2113_v37, 0.0 }
 0x5ee   : > { %v2104_v32 = vpop.f32.mrf.mxu0 }
 0x5ef   : > { %v2105_v35 = vadd.f32 %v2104_v32, %v2086_v25  ;;  %v2048_v40 = vmul.f32 %v2047_v36, %v2042_v33  ;;  %v2149_v25 = vstv %s3496_s6  ;;  %v2790_v32 = vld [vmem:[%s3623_s4] sm:$0xf]  ;;  %v2850_v33 = vld [vmem:[%s3623_s4 + $0x4] sm:$0xf0]  ;;  %s2312_s6 = sshll.u32 %s971_s11, 4  ;;  %s2313_s6 = int_to_ptr.vmem [resolvable:$true] %s2312_s6 }
 0x5f0   : > { %v2791_v37 = vor.u32 %v2850_v33, %v2790_v32 }
 0x5f1   : > { %v2110_v38 = vmul.f32 %v2108_v27, %v2105_v35  ;;  %v2052_v53 = vadd.f32 %v2051_v47, %v2048_v40  ;;  %v2146_v27 = vmul.f32 %v2145_v24, %v2016_v20  ;;  %v2849_v35 = vld [vmem:[%s3623_s4 + $0x4] sm:$0xf] }
 0x5f2   : > { %2225 = vmatpush.bf16.msra.mxu2 %v2791_v37 }
 0x5f3   : > { %v2114_v44 = vadd.f32 %v2112_v31, %v2110_v38  ;;  %v2054_v59 = vmax.f32 %v2052_v53, 0.0  ;;  %v2792_v38 = vld [vmem:[%s3623_s4 + $0x8] sm:$0xf0]  ;;  %s2996_s4 = sshra.s32 %s2315_s5, 4  ;;  %s2997_s4 = int_to_ptr.hbm [resolvable:$true] %s2996_s4 }
 0x5f4   : > { %v2043_v48 = vpop.f32.mrf.mxu2  ;;  %s2998_s16 = scalar_lea.hbm %s2997_s4, 16  ;;  %p3003_p13 = scmp.lt.s32.totalorder %s2997_s4, %s3238_s12 }
 0x5f5   : > { %v2116_v51 = vmax.f32 %v2114_v44, 0.0  ;;  %v2044_v52 = vadd.f32 %v2043_v48, %v2022_v28  ;;  %v2017_v44 = vadd.f32 %v2015_v15, %v2013_v30  ;;  %p2999_p9 = scmp.ne.s32.totalorder %s2997_s4, %s2998_s16  ;;  %p3004_p0 = scmp.lt.s32.totalorder %s3002_s17, %s2998_s16 }
 0x5f7   : > { %v2119_v54 = vpack.c.bf16 %v2116_v51, %v2115_v50  ;;  %v2049_v43 = vmul.f32 %v2047_v36, %v2044_v52  ;;  %v2147_v53 = vmul.f32 %v2145_v24, %v2017_v44  ;;  %p3000_p10 = pnand %p2999_p9, %p3278_p5  ;;  %p3005_p1 = por %p3004_p0, %p3003_p13 }
 0x5f9   : > { %v2053_v56 = vadd.f32 %v2051_v47, %v2049_v43  ;;  %2137 = vmatpush.bf16.msra.mxu1 %v2119_v54  ;;  %v2795_v47 = vor.u32 %v2849_v35, %v2792_v38  ;;  %p3001_p12 = pneg %p3000_p10 }
 0x5fb   : > { %v2055_v60 = vmax.f32 %v2053_v56, 0.0  ;;  %p3006_p2 = pnand %p3005_p1, %p3001_p12 }
 0x5fc   : > { %2782 = vmatmul.msk.bf16.vlgmr.msra.gmra.mxu1 %vm1015_vm0, %v2848_v55 }
 0x5fd   : > { %v2058_v61 = vpack.c.bf16 %v2055_v60, %v2054_v59 }
 0x5ff   : > { %2076 = vmatpush.bf16.msrb.mxu3 %v2058_v61 }
 0x602   : > { %2768 = vmatmul.msk.bf16.vlgmr.msrb.gmra.mxu3 %vm1015_vm0, %v2846_v62 }
 0x603   : > { %2239 = vmatpush.bf16.msra.mxu3 %v2795_v47 }
 0x679   : > { %v2139_v17 = vpop.f32.mrf.mxu1 }
 0x67a   : > { %v2140_v21 = vadd.f32 %v2139_v17, %v2121_v16 }
 0x67c   : > { %v2156_v29 = vmul.f32 %v2155_v22, %v2140_v21 }
 0x681   : > { %v2141_v36 = vpop.f32.mrf.mxu1 }
 0x682   : > { %v2142_v52 = vadd.f32 %v2141_v36, %v2121_v16 }
 0x684   : > { %v2157_v55 = vmul.f32 %v2155_v22, %v2142_v52 }
 0x685   : > { %v2078_v23 = vpop.f32.mrf.mxu3 }
 0x686   : > { %v2079_v26 = vadd.f32 %v2078_v23, %v2060_v18 }
 0x688   : > { %v2150_v28 = vmul.f32 %v2149_v25, %v2079_v26 }
 0x68a   : > { %v2152_v31 = vadd.f32 %v2150_v28, %v2146_v27 }
 0x68c   : > { %v2158_v40 = vadd.f32 %v2156_v29, %v2152_v31 }
 0x68d   : > { %v2080_v48 = vpop.f32.mrf.mxu3 }
 0x68e   : > { %v2786_v50 = vmul.f32 -1.442695, %v2158_v40  ;;  %v2081_v51 = vadd.f32 %v2080_v48, %v2060_v18 }
 0x690   : > { %2957 = vpow2.f32 %v2786_v50  ;;  %v2151_v54 = vmul.f32 %v2149_v25, %v2081_v51 }
 0x692   : > { %v2153_v43 = vadd.f32 %v2151_v54, %v2147_v53 }
 0x694   : > { %v2159_v56 = vadd.f32 %v2157_v55, %v2153_v43 }
 0x696   : > { %v2958_v59 = vpop.eup %2957  ;;  %v2787_v60 = vmul.f32 -1.442695, %v2159_v56 }
 0x697   : > { %v2166_v61 = vadd.f32 1.0, %v2958_v59 }
 0x698   : > { %2959 = vpow2.f32 %v2787_v60 }
 0x699   : > { %2961 = vrcp.f32 %v2166_v61  ;;  %v2179_v2 = vand.u32 2147483648, %v2166_v61  ;;  %v2177_v6 = vand.u32 2147483647, %v2166_v61  ;;  %vm2173_vm10 = vweird.f32 %v2166_v61 }
 0x69b   : > { %v2180_v9 = vor.u32 1.1754944e-38, %v2179_v2  ;;  %vm2178_vm12 = vcmp.eq.f32.partialorder %v2177_v6, 8.507059e+37 }
 0x69e   : > { %v2960_v62 = vpop.eup %2959 }
 0x69f   : > { %v2962_v63 = vpop.eup %2961  ;;  %v2167_v0 = vadd.f32 1.0, %v2960_v62 }
 0x6a0   : > { %v2169_v5 = vmul.f32 %v2962_v63, %v2166_v61  ;;  %vm2174_vm9 = vweird.f32 %v2962_v63 }
 0x6a1   : > { %2963 = vrcp.f32 %v2167_v0  ;;  %vm2175_vm11 = vmor %vm2173_vm10, %vm2174_vm9  ;;  %v2194_v15 = vand.u32 2147483648, %v2167_v0  ;;  %v2192_v17 = vand.u32 2147483647, %v2167_v0  ;;  %vm2188_vm14 = vweird.f32 %v2167_v0 }
 0x6a2   : > { %v2170_v49 = vsub.f32 1.0, %v2169_v5 }
 0x6a3   : > { %v2195_v19 = vor.u32 1.1754944e-38, %v2194_v15  ;;  %vm2193_vm1 = vcmp.eq.f32.partialorder %v2192_v17, 8.507059e+37 }
 0x6a4   : > { %v2171_v3 = vmul.f32 %v2962_v63, %v2170_v49 }
 0x6a6   : > { %v2172_v7 = vadd.f32 %v2962_v63, %v2171_v3 }
 0x6a7   : > { %v2964_v8 = vpop.eup %2963 }
 0x6a8   : > { %v2184_v10 = vmul.f32 %v2964_v8, %v2167_v0  ;;  %v2176_v11 = vsel %vm2175_vm11, %v2962_v63, %v2172_v7  ;;  %vm2189_vm13 = vweird.f32 %v2964_v8 }
 0x6a9   : > { %v2181_v12 = vsel %vm2178_vm12, %v2180_v9, %v2176_v11  ;;  %vm2190_vm15 = vmor %vm2188_vm14, %vm2189_vm13 }
 0x6aa   : > { %v2185_v13 = vsub.f32 1.0, %v2184_v10  ;;  %v2198_v14 = vmul.f32 %v2181_v12, %v3465_v45 }
 0x6ac   : > { %v2186_v16 = vmul.f32 %v2964_v8, %v2185_v13  ;;  %2200 = vst.msk [vmem:[%s971_s11] sm:$0xff] %vm1015_vm0, %v2198_v14 }
 0x6ae   : > { %v2187_v18 = vadd.f32 %v2964_v8, %v2186_v16 }
 0x6b0   : > { %v2191_v20 = vsel %vm2190_vm15, %v2964_v8, %v2187_v18 }
 0x6b1   : > { %v2196_v21 = vsel %vm2193_vm1, %v2195_v19, %v2191_v20 }
 0x6b2   : > { %v2199_v23 = vmul.f32 %v2196_v21, %v3467_v46  ;;  %v2204_v45 = vpack.c.bf16 %v2196_v21, %v2181_v12 }
 0x6b4   : > { %2796 = vmatmul.msk.bf16.vlgmr.msra.gmra.mxu2 %vm1015_vm0, %v2204_v45  ;;  %2797 = vmatmul.msk.bf16.vlgmr.msra.gmra.mxu3 %vm1015_vm0, %v2204_v45  ;;  %2201 = vst.msk [vmem:[%s971_s11 + $0x8] sm:$0xff] %vm1015_vm0, %v2199_v23 }
 0x6b5   : > { %3009 = shalt.err (!%p3006_p2)
}
 0x6b6   : > { %s3083_s0 = smov 128   ;;  %s3084_s11 = smov 8   ;;  %v2965_v52 = vld [vmem:[%s3326_s2] sm:$0xff]  ;;  %v2966_v43 = vld [vmem:[%s3326_s2 + $0x8] sm:$0xff] }
 0x6b7   : > { %2856 = dma.vmem_to_hbm [thread:$0]  (%p3278_p5), %s2313_s6, 256, %s2315_s5, %s2291_s13, %s3083_s0, %s3083_s0, %s3084_s11  }
 0x6b8   : > { %s994_s17 = scalar_lea.vmem %s3223_s9, %s3322_s26  ;;  %s999_s28 = scalar_lea.vmem %s3228_s20, %s3322_s26 }
 0x737   : > { %v2227_v46 = vpop.f32.mrf.mxu2  ;;  %v2241_v24 = vpop.f32.mrf.mxu3 }
 0x738   : > { %v2246_v26 = vmul.f32 %v2227_v46, %v3427_v34  ;;  %v2247_v27 = vmul.f32 %v2241_v24, %v3430_v39 }
 0x73f   : > { %v2229_v25 = vpop.f32.mrf.mxu2  ;;  %v2243_v22 = vpop.f32.mrf.mxu3 }
 0x740   : > { %v2248_v28 = vmul.f32 %v2229_v25, %v3440_v1  ;;  %v2249_v29 = vmul.f32 %v2243_v22, %v3443_v4 }
 0x742   : > { %v2250_v30 = vadd.f32 %v2248_v28, %v2246_v26  ;;  %v2257_v31 = vadd.f32 %v2249_v29, %v2247_v27 }
 0x744   : > { %v2251_v32 = vrot.slane %v2250_v30, 4  ;;  %v2258_v33 = vrot.slane %v2257_v31, 4 }
 0x746   : > { %v2252_v35 = vadd.f32 %v2251_v32, %v2250_v30  ;;  %v2259_v36 = vadd.f32 %v2258_v33, %v2257_v31 }
 0x748   : > { %v2253_v37 = vrot.slane %v2252_v35, 2  ;;  %v2260_v38 = vrot.slane %v2259_v36, 2 }
 0x74a   : > { %v2254_v34 = vadd.f32 %v2253_v37, %v2252_v35  ;;  %v2261_v39 = vadd.f32 %v2260_v38, %v2259_v36 }
 0x74c   : > { %v2255_v40 = vrot.slane %v2254_v34, 1  ;;  %v2262_v1 = vrot.slane %v2261_v39, 1 }
 0x74e   : > { %v2256_v44 = vadd.f32 %v2255_v40, %v2254_v34  ;;  %v2263_v4 = vadd.f32 %v2262_v1, %v2261_v39 }
 0x750   : > { %v2264_v47 = vmul.f32 %v2256_v44, %v3407_v57  ;;  %v2270_v48 = vmul.f32 %v2256_v44, %v3394_v41  ;;  %v2265_v50 = vmul.f32 %v2263_v4, %v3410_v58  ;;  %v2271_v51 = vmul.f32 %v2263_v4, %v3396_v42 }
 0x752   : > { %v2266_v53 = vadd.f32 %v2965_v52, %v2264_v47  ;;  %v2272_v54 = vadd.f32 %v2270_v48, %v3394_v41  ;;  %v2267_v55 = vadd.f32 %v2966_v43, %v2265_v50  ;;  %v2273_v56 = vadd.f32 %v2271_v51, %v3396_v42 }
 0x754   : > { %2268 = vst [vmem:[%s994_s17] sm:$0xff] %v2266_v53 }
 0x755   : > { %2274 = vst [vmem:[%s999_s28] sm:$0xff] %v2272_v54 }
 0x756   : > { %2269 = vst [vmem:[%s994_s17 + $0x8] sm:$0xff] %v2267_v55 }
 0x757   : > { %2275 = vst [vmem:[%s999_s28 + $0x8] sm:$0xff] %v2273_v56 }
 0x758 PF: > { %p2868_p5 = scmp.ge.s32.totalorder %s3048_s15, 2  ;;  %s2352_s16 = sand.u32 1, %s3036_s7  }
 0x759   : > { %s2353_s26 = scalar_lea.sflag [#allocation3], %s2352_s16 }
 0x75a   : > { %p2863_p3 = pnand %p2868_p5, %p3282_p6 }
 0x75c   : > { %p2864_p4 = pneg %p2863_p3 }
 0x75e   : > { %3031 = dma.done.wait (%p2864_p4), %s2353_s26, 256  }
 0x75f   : > { %3033 = vsyncadd (%p2864_p4), %s2353_s26, 4294967040  ;;  %s3624_s15 = sld [smem:[#allocation29_spill]]  ;;  %s3627_s7 = smov %s3040_s10 }
 0x760   : > { %s3625_s2 = sld [smem:[#allocation28_spill]] }
 0x761   : > { %s3626_s11 = sld [smem:[#allocation30_spill]] }
 0x765   : > { %p71_p7 = scmp.ge.s32.totalorder %s3624_s15, 4  }
 0x766   : > { %s3628_s10 = smov %s3625_s2 }
 0x767   :  { %73 = sbr.rel (!%p71_p7) target bundleno = 59 (0x3b), region = 250 }
 0x76c   :  { %2359 = vsyncpa [#allocation3], 1 }
 0x76d   :  { %2361 = vsyncpa [#allocation3 + $0x1], 1 }
 0x76e   :  { %2362 = vsyncpa [#allocation4], 1 }
 0x76f   :  { %2364 = vsyncpa [#allocation4 + $0x1], 1 }

</bundles_post_ra>
